<compile_context>
chip_gen: v7x
topology: tpu7x:2x2x1
jax: 0.10.0
libtpu: 0.0.40
codegen_flags: <defaults>
</compile_context>

<pallas_src>
import functools
import math

import jax
import jax.numpy as jnp
from jax.experimental import pallas as pl
from jax.experimental.pallas import tpu as pltpu

F32 = jnp.float32
BF16 = jnp.bfloat16
EPS = 1e-5          # nn.BatchNorm2d default
NEG_SLOPE = 0.01    # nn.LeakyReLU default


def _round_up(x, m):
    return (x + m - 1) // m * m


# ---------------------------------------------------------------------------
# Kernel 1: 3x3 conv (stride 1, pad 1, no bias) as 3 accumulated MXU matmuls
#           (kw folded into K), fused with BatchNorm batch statistics.
# ---------------------------------------------------------------------------
def _conv3x3_stats_kernel(x_ref, w_ref, y_ref, st_ref, *, tm, wk):
    j = pl.program_id(1)

    @pl.when(j == 0)
    def _init():
        st_ref[...] = jnp.zeros_like(st_ref)

    cout = y_ref.shape[-1]
    acc = jnp.zeros((tm, cout), jnp.float32)
    for kh in range(3):                                     # kh = aligned row shift
        start = pl.multiple_of(j * tm + kh * wk, 16)
        xt = x_ref[pl.ds(start, tm), :]                     # bf16, kw folded in lanes
        acc = acc + jnp.dot(xt, w_ref[kh], preferred_element_type=jnp.float32)

    y_ref[...] = acc

    # Fused BN batch statistics.  Padded / out-of-image positions are exactly
    # zero by construction, so they add nothing; the wrapper divides by the
    # true valid count.  Direct sublane-slice accumulation (no iota / where).
    st_ref[0:1, :] += jnp.sum(acc, axis=0, keepdims=True)
    st_ref[1:2, :] += jnp.sum(acc * acc, axis=0, keepdims=True)


# ---------------------------------------------------------------------------
# Kernel 2: BatchNorm apply + LeakyReLU, lane-dense (full 128-lane stores).
# ---------------------------------------------------------------------------
def _bn_lrelu_kernel(y_ref, s_ref, b_ref, o_ref):
    y = y_ref[...] * s_ref[...] + b_ref[...]
    o_ref[...] = jnp.where(y > 0, y, NEG_SLOPE * y).astype(o_ref.dtype)


# ---------------------------------------------------------------------------
# Wrappers
# ---------------------------------------------------------------------------
def _make_conv_input(a, wk, rows_in):
    """a: (n, h, w, cin) -> (n, rows_in, 3*cin) bf16 kw-folded padded views.

    Row r = h_i*wk + w_o holds, in lanes [kw*cin:(kw+1)*cin], the padded pixel
    x[h_i-1, w_o+kw-1] (exactly zero outside the image).  The 3x3 / pad-1
    output at (h_o, w_o) is sum_kh  row[h_o*wk + w_o + kh*wk] @ W[kh].
    """
    n, h, w, cin = a.shape
    a = a.astype(BF16)
    ap = jnp.pad(a, ((0, 0), (1, 1), (1, wk - w + 1), (0, 0)))
    views = []
    for kw in range(3):
        v = ap[:, :, kw:kw + wk, :]
        if wk != w:  # zero the junk output columns in every tap
            col_ok = (jnp.arange(wk) < w)[None, None, :, None]
            v = jnp.where(col_ok, v, 0)
        views.append(v)
    xcat = jnp.concatenate(views, axis=-1).reshape(n, (h + 2) * wk, 3 * cin)
    return jnp.pad(xcat, ((0, 0), (0, rows_in - (h + 2) * wk), (0, 0)))


def conv3x3_bn_stats(a, w3, gamma, beta):
    """3x3 conv (pad 1, no bias) with fused BatchNorm batch statistics.

    a:  (n, h, w, cin) NHWC activation (any float dtype)
    w3: (3, 3*cin, cout) f32 weights, rows ordered as kw*cin + c
    Returns raw conv output y (n, mpad, cout) on the padded row grid, the
    BN scale/bias folded with the batch statistics, and layout metadata.
    """
    n, h, w, cin = a.shape
    cout = w3.shape[-1]
    wk = _round_up(w, 16)                      # row pitch, bf16-tile aligned
    mout = h * wk                              # valid output rows per image
    cap = max(128, (16384 // cout) // 128 * 128)   # keep acc well under vreg file
    tm = min(cap, _round_up(mout, 128))
    nblk = pl.cdiv(mout, tm)
    mpad = nblk * tm
    rows_in = mpad + 2 * wk                    # kh halo; tail rows are zero
    kdim = 3 * cin

    x = _make_conv_input(a, wk, rows_in)       # bf16 once; no per-tap cast
    w3 = w3.astype(BF16)

    # Per-grid-step VMEM: one whole-image input block (resident across the
    # row-block axis) + double-buffered weight / output tiles.
    # TODO(synk): for very large single images, stream the input along M with
    # a 2*wk-row halo (manual DMA) instead of whole-image residency.
    need = (2 * rows_in * kdim * 2 + 2 * 3 * kdim * cout * 2
            + 2 * tm * cout * 4 + 2 * 8 * cout * 4)
    vmem_limit = int(min(max(need + (4 << 20), 32 << 20), 60 << 20))

    y, st = pl.pallas_call(
        functools.partial(_conv3x3_stats_kernel, tm=tm, wk=wk),
        out_shape=(jax.ShapeDtypeStruct((n, mpad, cout), F32),
                   jax.ShapeDtypeStruct((n, 8, cout), F32)),
        grid_spec=pltpu.PrefetchScalarGridSpec(
            num_scalar_prefetch=0,
            grid=(n, nblk),
            in_specs=[
                pl.BlockSpec((None, rows_in, kdim), lambda b, j: (b, 0, 0)),
                pl.BlockSpec((3, kdim, cout), lambda b, j: (0, 0, 0)),
            ],
            out_specs=(
                pl.BlockSpec((None, tm, cout), lambda b, j: (b, j, 0)),
                pl.BlockSpec((None, 8, cout), lambda b, j: (b, 0, 0)),
            ),
        ),
        compiler_params=pltpu.CompilerParams(
            dimension_semantics=("parallel", "arbitrary"),
            vmem_limit_bytes=vmem_limit),
    )(x, w3)

    cnt = float(n * h * w)
    mean = jnp.sum(st[:, 0, :], axis=0) / cnt
    var = jnp.maximum(jnp.sum(st[:, 1, :], axis=0) / cnt - mean * mean, 0.0)
    scale = gamma * jax.lax.rsqrt(var + EPS)
    bias = beta - mean * scale
    meta = dict(n=n, h=h, w=w, wk=wk, mout=mout, mpad=mpad, tm=tm,
                nblk=nblk, cout=cout)
    return y, scale, bias, meta


def _unpack_nhwc(y, meta):
    n, h, w, wk, cout = meta["n"], meta["h"], meta["w"], meta["wk"], meta["cout"]
    return y[:, :meta["mout"], :].reshape(n, h, wk, cout)[:, :, :w, :]


def _bn_lrelu_into_next_conv(y, scale, bias, meta):
    """Layer-1 BN-apply + LeakyReLU folded into the next conv's input prep.

    Training-mode BN forces a second pass over y; instead of a standalone
    kernel (full HBM write + re-read of the activation), the per-channel
    affine + leaky is applied here, in the same XLA fusion that builds conv2's
    padded kw-folded bf16 views.  The conv padding is re-applied *after* the
    activation, so padded zeros stay exactly zero (torch semantics).
    """
    a = _unpack_nhwc(y, meta)
    a = a * scale + bias
    return jnp.where(a > 0, a, NEG_SLOPE * a).astype(BF16)


def bn_lrelu_lane_dense(y, scale, bias, meta):
    """Final BN-apply + LeakyReLU over the padded conv output, lane-dense."""
    n, mpad, cout = y.shape
    if cout <= 128 and 128 % cout == 0:
        p = min(128 // cout, 16)               # spatial rows packed per vector row
    else:
        p = 1
    lanes = p * cout
    rows = (n * mpad) // p
    tr = meta["tm"] // p                       # multiple of 8, divides rows
    grid = (rows // tr,)

    out = pl.pallas_call(
        _bn_lrelu_kernel,
        out_shape=jax.ShapeDtypeStruct((rows, lanes), F32),
        grid_spec=pltpu.PrefetchScalarGridSpec(
            num_scalar_prefetch=0,
            grid=grid,
            in_specs=[
                pl.BlockSpec((tr, lanes), lambda i: (i, 0)),
                pl.BlockSpec((1, lanes), lambda i: (0, 0)),
                pl.BlockSpec((1, lanes), lambda i: (0, 0)),
            ],
            out_specs=pl.BlockSpec((tr, lanes), lambda i: (i, 0)),
        ),
        compiler_params=pltpu.CompilerParams(
            dimension_semantics=("parallel",)),
    )(y.reshape(rows, lanes),
      jnp.tile(scale.astype(F32), p).reshape(1, lanes),
      jnp.tile(bias.astype(F32), p).reshape(1, lanes))

    return _unpack_nhwc(out.reshape(n, mpad, cout), meta)


def convblock_apply(params, x_nchw):
    x = jnp.transpose(x_nchw, (0, 2, 3, 1)).astype(F32)        # NCHW -> NHWC
    y1, s1, b1, m1 = conv3x3_bn_stats(x, params["w1"], params["g1"], params["b1"])
    a1 = _bn_lrelu_into_next_conv(y1, s1, b1, m1)              # bf16, feeds conv2
    y2, s2, b2, m2 = conv3x3_bn_stats(a1, params["w2"], params["g2"], params["b2"])
    out = bn_lrelu_lane_dense(y2, s2, b2, m2)                  # f32 NHWC
    return jnp.transpose(out, (0, 3, 1, 2))                    # NHWC -> NCHW


# ---------------------------------------------------------------------------
# Parameters (shapes / distribution family of a fresh torch ConvBlock)
# ---------------------------------------------------------------------------
def _conv_weight(key, cin, cout):
    # torch Conv2d default kaiming_uniform_(a=sqrt(5)) == U(+-1/sqrt(9*cin)).
    bound = 1.0 / math.sqrt(cin * 9)
    wt = jax.random.uniform(key, (cout, cin, 3, 3), F32, -bound, bound)
    # (out, in, kh, kw) -> (kh, kw, in, out) -> (3, 3*cin, out): rows kw*cin+c
    # match the kw-concatenated input views.
    return jnp.transpose(wt, (2, 3, 1, 0)).reshape(3, 3 * cin, cout)


def convblock_init(key, in_channels, out_channels):
    k1, k2 = jax.random.split(key)
    return {
        "w1": _conv_weight(k1, in_channels, out_channels),
        "g1": jnp.ones((out_channels,), F32),   # BN affine defaults: gamma=1
        "b1": jnp.zeros((out_channels,), F32),  #                     beta=0
        "w2": _conv_weight(k2, out_channels, out_channels),
        "g2": jnp.ones((out_channels,), F32),
        "b2": jnp.zeros((out_channels,), F32),
    }


# ---------------------------------------------------------------------------
if __name__ == "__main__":
    root = jax.random.PRNGKey(0)
    pkey, xkey = jax.random.split(root)

    in_channels, out_channels = 4, 32
    params = convblock_init(pkey, in_channels, out_channels)
    x = jax.random.normal(xkey, (2, in_channels, 16, 16), F32)   # NCHW, like torch

    fwd = jax.jit(convblock_apply)
    out = jax.block_until_ready(fwd(params, x))

    assert out.shape == (2, out_channels, 16, 16), out.shape
    assert bool(jnp.all(jnp.isfinite(out)))
    print("KERNEL_OK")
</pallas_src>

<mosaic_0001>
module attributes {stable_mosaic.version = 11 : i64} {
  func.func @_conv3x3_stats_kernel(%arg0: i32, %arg1: i32, %arg2: memref<1x288x12xbf16, #tpu.memory_space<vmem>>, %arg3: memref<3x12x32xbf16, #tpu.memory_space<vmem>>, %arg4: memref<1x256x32xf32, #tpu.memory_space<vmem>>, %arg5: memref<1x8x32xf32, #tpu.memory_space<vmem>>) attributes {dimension_semantics = [#tpu.dimension_semantics<parallel>, #tpu.dimension_semantics<arbitrary>], iteration_bounds = array<i64: 2, 1>, scalar_prefetch = 0 : i64, scratch_operands = 0 : i64, tpu.core_type = #tpu.core_type<tc>, window_params = [{transform_indices = @transform_0, window_bounds = array<i64: 1, 288, 12>}, {pipeline_mode = #tpu.pipeline_mode<synchronous>, transform_indices = @transform_1, window_bounds = array<i64: 3, 12, 32>}, {transform_indices = @transform_2, window_bounds = array<i64: 1, 256, 32>}, {transform_indices = @transform_3, window_bounds = array<i64: 1, 8, 32>}]} {
    %c0_i32 = arith.constant 0 : i32
    %0 = arith.cmpi eq, %arg1, %c0_i32 : i32
    %1 = arith.extui %0 : i1 to i32
    %c0_i32_0 = arith.constant 0 : i32
    %2 = arith.cmpi ne, %1, %c0_i32_0 : i32
    scf.if %2 {
      %cst_36 = arith.constant 0.000000e+00 : f32
      %54 = vector.broadcast %cst_36 : f32 to vector<8x32xf32>
      %c0_37 = arith.constant 0 : index
      %c0_38 = arith.constant 0 : index
      %c0_39 = arith.constant 0 : index
      %55 = vector.load %arg5[%c0_37, %c0_38, %c0_39] : memref<1x8x32xf32, #tpu.memory_space<vmem>>, vector<1x8x32xf32>
      %56 = vector.shape_cast %55 : vector<1x8x32xf32> to vector<8x32xf32>
      %57 = vector.shape_cast %54 : vector<8x32xf32> to vector<1x8x32xf32>
      tpu.vector_store %arg5[%c0_37, %c0_38, %c0_39], %57 {strides = array<i32>} : memref<1x8x32xf32, #tpu.memory_space<vmem>>, vector<1x8x32xf32>,
    } else {
    }
    %cst = arith.constant 0.000000e+00 : f32
    %3 = vector.broadcast %cst : f32 to vector<256x32xf32>
    %c256_i32 = arith.constant 256 : i32
    %4 = arith.muli %arg1, %c256_i32 : i32
    %c0_i32_1 = arith.constant 0 : i32
    %5 = arith.addi %4, %c0_i32_1 : i32
    %6 = tpu.assume_multiple %5, 16 : i32
    %c0 = arith.constant 0 : index
    %7 = arith.index_cast %6 : i32 to index
    %c0_2 = arith.constant 0 : index
    %8 = vector.load %arg2[%c0, %7, %c0_2] : memref<1x288x12xbf16, #tpu.memory_space<vmem>>, vector<1x256x12xbf16>
    %9 = vector.shape_cast %8 : vector<1x256x12xbf16> to vector<256x12xbf16>
    %c0_3 = arith.constant 0 : index
    %c0_4 = arith.constant 0 : index
    %c0_5 = arith.constant 0 : index
    %10 = vector.load %arg3[%c0_3, %c0_4, %c0_5] : memref<3x12x32xbf16, #tpu.memory_space<vmem>>, vector<1x12x32xbf16>
    %11 = vector.shape_cast %10 : vector<1x12x32xbf16> to vector<12x32xbf16>
    %cst_6 = arith.constant dense<0.000000e+00> : vector<256x32xf32>
    %12 = tpu.matmul %9, %11, %cst_6 {dimension_numbers = #tpu.dot_dimension_numbers<[1], [0], [0], [1], [0, 0, 1, 1], [], []>} : vector<256x12xbf16>, vector<12x32xbf16>, vector<256x32xf32> -> vector<256x32xf32>
    %13 = arith.addf %3, %12 : vector<256x32xf32>
    %c256_i32_7 = arith.constant 256 : i32
    %14 = arith.muli %arg1, %c256_i32_7 : i32
    %c16_i32 = arith.constant 16 : i32
    %15 = arith.addi %14, %c16_i32 : i32
    %16 = tpu.assume_multiple %15, 16 : i32
    %c0_8 = arith.constant 0 : index
    %17 = arith.index_cast %16 : i32 to index
    %c0_9 = arith.constant 0 : index
    %18 = vector.load %arg2[%c0_8, %17, %c0_9] : memref<1x288x12xbf16, #tpu.memory_space<vmem>>, vector<1x256x12xbf16>
    %19 = vector.shape_cast %18 : vector<1x256x12xbf16> to vector<256x12xbf16>
    %c1 = arith.constant 1 : index
    %c0_10 = arith.constant 0 : index
    %c0_11 = arith.constant 0 : index
    %20 = vector.load %arg3[%c1, %c0_10, %c0_11] : memref<3x12x32xbf16, #tpu.memory_space<vmem>>, vector<1x12x32xbf16>
    %21 = vector.shape_cast %20 : vector<1x12x32xbf16> to vector<12x32xbf16>
    %cst_12 = arith.constant dense<0.000000e+00> : vector<256x32xf32>
    %22 = tpu.matmul %19, %21, %cst_12 {dimension_numbers = #tpu.dot_dimension_numbers<[1], [0], [0], [1], [0, 0, 1, 1], [], []>} : vector<256x12xbf16>, vector<12x32xbf16>, vector<256x32xf32> -> vector<256x32xf32>
    %23 = arith.addf %13, %22 : vector<256x32xf32>
    %c256_i32_13 = arith.constant 256 : i32
    %24 = arith.muli %arg1, %c256_i32_13 : i32
    %c32_i32 = arith.constant 32 : i32
    %25 = arith.addi %24, %c32_i32 : i32
    %26 = tpu.assume_multiple %25, 16 : i32
    %c0_14 = arith.constant 0 : index
    %27 = arith.index_cast %26 : i32 to index
    %c0_15 = arith.constant 0 : index
    %28 = vector.load %arg2[%c0_14, %27, %c0_15] : memref<1x288x12xbf16, #tpu.memory_space<vmem>>, vector<1x256x12xbf16>
    %29 = vector.shape_cast %28 : vector<1x256x12xbf16> to vector<256x12xbf16>
    %c2 = arith.constant 2 : index
    %c0_16 = arith.constant 0 : index
    %c0_17 = arith.constant 0 : index
    %30 = vector.load %arg3[%c2, %c0_16, %c0_17] : memref<3x12x32xbf16, #tpu.memory_space<vmem>>, vector<1x12x32xbf16>
    %31 = vector.shape_cast %30 : vector<1x12x32xbf16> to vector<12x32xbf16>
    %cst_18 = arith.constant dense<0.000000e+00> : vector<256x32xf32>
    %32 = tpu.matmul %29, %31, %cst_18 {dimension_numbers = #tpu.dot_dimension_numbers<[1], [0], [0], [1], [0, 0, 1, 1], [], []>} : vector<256x12xbf16>, vector<12x32xbf16>, vector<256x32xf32> -> vector<256x32xf32>
    %33 = arith.addf %23, %32 : vector<256x32xf32>
    %c0_19 = arith.constant 0 : index
    %c0_20 = arith.constant 0 : index
    %c0_21 = arith.constant 0 : index
    %34 = vector.load %arg4[%c0_19, %c0_20, %c0_21] : memref<1x256x32xf32, #tpu.memory_space<vmem>>, vector<1x256x32xf32>
    %35 = vector.shape_cast %34 : vector<1x256x32xf32> to vector<256x32xf32>
    %36 = vector.shape_cast %33 : vector<256x32xf32> to vector<1x256x32xf32>
    tpu.vector_store %arg4[%c0_19, %c0_20, %c0_21], %36 {strides = array<i32>} : memref<1x256x32xf32, #tpu.memory_space<vmem>>, vector<1x256x32xf32>,
    %c0_22 = arith.constant 0 : index
    %c0_23 = arith.constant 0 : index
    %c0_24 = arith.constant 0 : index
    %37 = vector.load %arg5[%c0_22, %c0_23, %c0_24] : memref<1x8x32xf32, #tpu.memory_space<vmem>>, vector<1x1x32xf32>
    %38 = vector.shape_cast %37 : vector<1x1x32xf32> to vector<1x32xf32>
    %cst_25 = arith.constant dense<0.000000e+00> : vector<32xf32>
    %39 = vector.multi_reduction <add>, %33, %cst_25 [0] : vector<256x32xf32> to vector<32xf32>
    %40 = vector.shape_cast %39 : vector<32xf32> to vector<1x32xf32>
    %41 = arith.addf %38, %40 : vector<1x32xf32>
    %c0_26 = arith.constant 0 : index
    %c0_27 = arith.constant 0 : index
    %c0_28 = arith.constant 0 : index
    %42 = vector.load %arg5[%c0_26, %c0_27, %c0_28] : memref<1x8x32xf32, #tpu.memory_space<vmem>>, vector<1x1x32xf32>
    %43 = vector.shape_cast %42 : vector<1x1x32xf32> to vector<1x32xf32>
    %44 = vector.shape_cast %41 : vector<1x32xf32> to vector<1x1x32xf32>
    tpu.vector_store %arg5[%c0_26, %c0_27, %c0_28], %44 {strides = array<i32>} : memref<1x8x32xf32, #tpu.memory_space<vmem>>, vector<1x1x32xf32>,
    %c0_29 = arith.constant 0 : index
    %c1_30 = arith.constant 1 : index
    %c0_31 = arith.constant 0 : index
    %45 = vector.load %arg5[%c0_29, %c1_30, %c0_31] : memref<1x8x32xf32, #tpu.memory_space<vmem>>, vector<1x1x32xf32>
    %46 = vector.shape_cast %45 : vector<1x1x32xf32> to vector<1x32xf32>
    %47 = arith.mulf %33, %33 : vector<256x32xf32>
    %cst_32 = arith.constant dense<0.000000e+00> : vector<32xf32>
    %48 = vector.multi_reduction <add>, %47, %cst_32 [0] : vector<256x32xf32> to vector<32xf32>
    %49 = vector.shape_cast %48 : vector<32xf32> to vector<1x32xf32>
    %50 = arith.addf %46, %49 : vector<1x32xf32>
    %c0_33 = arith.constant 0 : index
    %c1_34 = arith.constant 1 : index
    %c0_35 = arith.constant 0 : index
    %51 = vector.load %arg5[%c0_33, %c1_34, %c0_35] : memref<1x8x32xf32, #tpu.memory_space<vmem>>, vector<1x1x32xf32>
    %52 = vector.shape_cast %51 : vector<1x1x32xf32> to vector<1x32xf32>
    %53 = vector.shape_cast %50 : vector<1x32xf32> to vector<1x1x32xf32>
    tpu.vector_store %arg5[%c0_33, %c1_34, %c0_35], %53 {strides = array<i32>} : memref<1x8x32xf32, #tpu.memory_space<vmem>>, vector<1x1x32xf32>,
    return
  }
  func.func @transform_0(%arg0: i32, %arg1: i32) -> (i32, i32, i32) {
    %c0_i32 = arith.constant 0 : i32
    %c0_i32_0 = arith.constant 0 : i32
    %c0_i32_1 = arith.constant 0 : i32
    return %arg0, %c0_i32, %c0_i32_0 : i32, i32, i32
  }
  func.func @transform_1(%arg0: i32, %arg1: i32) -> (i32, i32, i32) {
    %c0_i32 = arith.constant 0 : i32
    %c0_i32_0 = arith.constant 0 : i32
    %c0_i32_1 = arith.constant 0 : i32
    %c0_i32_2 = arith.constant 0 : i32
    return %c0_i32, %c0_i32_0, %c0_i32_1 : i32, i32, i32
  }
  func.func @transform_2(%arg0: i32, %arg1: i32) -> (i32, i32, i32) {
    %c0_i32 = arith.constant 0 : i32
    %c0_i32_0 = arith.constant 0 : i32
    return %arg0, %arg1, %c0_i32 : i32, i32, i32
  }
  func.func @transform_3(%arg0: i32, %arg1: i32) -> (i32, i32, i32) {
    %c0_i32 = arith.constant 0 : i32
    %c0_i32_0 = arith.constant 0 : i32
    %c0_i32_1 = arith.constant 0 : i32
    return %arg0, %c0_i32, %c0_i32_0 : i32, i32, i32
  }
}

module attributes {stable_mosaic.version = 11 : i64} {
  func.func @_conv3x3_stats_kernel(%arg0: i32, %arg1: i32, %arg2: memref<1x288x96xbf16, #tpu.memory_space<vmem>>, %arg3: memref<3x96x32xbf16, #tpu.memory_space<vmem>>, %arg4: memref<1x256x32xf32, #tpu.memory_space<vmem>>, %arg5: memref<1x8x32xf32, #tpu.memory_space<vmem>>) attributes {dimension_semantics = [#tpu.dimension_semantics<parallel>, #tpu.dimension_semantics<arbitrary>], iteration_bounds = array<i64: 2, 1>, scalar_prefetch = 0 : i64, scratch_operands = 0 : i64, tpu.core_type = #tpu.core_type<tc>, window_params = [{transform_indices = @transform_0, window_bounds = array<i64: 1, 288, 96>}, {pipeline_mode = #tpu.pipeline_mode<synchronous>, transform_indices = @transform_1, window_bounds = array<i64: 3, 96, 32>}, {transform_indices = @transform_2, window_bounds = array<i64: 1, 256, 32>}, {transform_indices = @transform_3, window_bounds = array<i64: 1, 8, 32>}]} {
    %c0_i32 = arith.constant 0 : i32
    %0 = arith.cmpi eq, %arg1, %c0_i32 : i32
    %1 = arith.extui %0 : i1 to i32
    %c0_i32_0 = arith.constant 0 : i32
    %2 = arith.cmpi ne, %1, %c0_i32_0 : i32
    scf.if %2 {
      %cst_36 = arith.constant 0.000000e+00 : f32
      %54 = vector.broadcast %cst_36 : f32 to vector<8x32xf32>
      %c0_37 = arith.constant 0 : index
      %c0_38 = arith.constant 0 : index
      %c0_39 = arith.constant 0 : index
      %55 = vector.load %arg5[%c0_37, %c0_38, %c0_39] : memref<1x8x32xf32, #tpu.memory_space<vmem>>, vector<1x8x32xf32>
      %56 = vector.shape_cast %55 : vector<1x8x32xf32> to vector<8x32xf32>
      %57 = vector.shape_cast %54 : vector<8x32xf32> to vector<1x8x32xf32>
      tpu.vector_store %arg5[%c0_37, %c0_38, %c0_39], %57 {strides = array<i32>} : memref<1x8x32xf32, #tpu.memory_space<vmem>>, vector<1x8x32xf32>,
    } else {
    }
    %cst = arith.constant 0.000000e+00 : f32
    %3 = vector.broadcast %cst : f32 to vector<256x32xf32>
    %c256_i32 = arith.constant 256 : i32
    %4 = arith.muli %arg1, %c256_i32 : i32
    %c0_i32_1 = arith.constant 0 : i32
    %5 = arith.addi %4, %c0_i32_1 : i32
    %6 = tpu.assume_multiple %5, 16 : i32
    %c0 = arith.constant 0 : index
    %7 = arith.index_cast %6 : i32 to index
    %c0_2 = arith.constant 0 : index
    %8 = vector.load %arg2[%c0, %7, %c0_2] : memref<1x288x96xbf16, #tpu.memory_space<vmem>>, vector<1x256x96xbf16>
    %9 = vector.shape_cast %8 : vector<1x256x96xbf16> to vector<256x96xbf16>
    %c0_3 = arith.constant 0 : index
    %c0_4 = arith.constant 0 : index
    %c0_5 = arith.constant 0 : index
    %10 = vector.load %arg3[%c0_3, %c0_4, %c0_5] : memref<3x96x32xbf16, #tpu.memory_space<vmem>>, vector<1x96x32xbf16>
    %11 = vector.shape_cast %10 : vector<1x96x32xbf16> to vector<96x32xbf16>
    %cst_6 = arith.constant dense<0.000000e+00> : vector<256x32xf32>
    %12 = tpu.matmul %9, %11, %cst_6 {dimension_numbers = #tpu.dot_dimension_numbers<[1], [0], [0], [1], [0, 0, 1, 1], [], []>} : vector<256x96xbf16>, vector<96x32xbf16>, vector<256x32xf32> -> vector<256x32xf32>
    %13 = arith.addf %3, %12 : vector<256x32xf32>
    %c256_i32_7 = arith.constant 256 : i32
    %14 = arith.muli %arg1, %c256_i32_7 : i32
    %c16_i32 = arith.constant 16 : i32
    %15 = arith.addi %14, %c16_i32 : i32
    %16 = tpu.assume_multiple %15, 16 : i32
    %c0_8 = arith.constant 0 : index
    %17 = arith.index_cast %16 : i32 to index
    %c0_9 = arith.constant 0 : index
    %18 = vector.load %arg2[%c0_8, %17, %c0_9] : memref<1x288x96xbf16, #tpu.memory_space<vmem>>, vector<1x256x96xbf16>
    %19 = vector.shape_cast %18 : vector<1x256x96xbf16> to vector<256x96xbf16>
    %c1 = arith.constant 1 : index
    %c0_10 = arith.constant 0 : index
    %c0_11 = arith.constant 0 : index
    %20 = vector.load %arg3[%c1, %c0_10, %c0_11] : memref<3x96x32xbf16, #tpu.memory_space<vmem>>, vector<1x96x32xbf16>
    %21 = vector.shape_cast %20 : vector<1x96x32xbf16> to vector<96x32xbf16>
    %cst_12 = arith.constant dense<0.000000e+00> : vector<256x32xf32>
    %22 = tpu.matmul %19, %21, %cst_12 {dimension_numbers = #tpu.dot_dimension_numbers<[1], [0], [0], [1], [0, 0, 1, 1], [], []>} : vector<256x96xbf16>, vector<96x32xbf16>, vector<256x32xf32> -> vector<256x32xf32>
    %23 = arith.addf %13, %22 : vector<256x32xf32>
    %c256_i32_13 = arith.constant 256 : i32
    %24 = arith.muli %arg1, %c256_i32_13 : i32
    %c32_i32 = arith.constant 32 : i32
    %25 = arith.addi %24, %c32_i32 : i32
    %26 = tpu.assume_multiple %25, 16 : i32
    %c0_14 = arith.constant 0 : index
    %27 = arith.index_cast %26 : i32 to index
    %c0_15 = arith.constant 0 : index
    %28 = vector.load %arg2[%c0_14, %27, %c0_15] : memref<1x288x96xbf16, #tpu.memory_space<vmem>>, vector<1x256x96xbf16>
    %29 = vector.shape_cast %28 : vector<1x256x96xbf16> to vector<256x96xbf16>
    %c2 = arith.constant 2 : index
    %c0_16 = arith.constant 0 : index
    %c0_17 = arith.constant 0 : index
    %30 = vector.load %arg3[%c2, %c0_16, %c0_17] : memref<3x96x32xbf16, #tpu.memory_space<vmem>>, vector<1x96x32xbf16>
    %31 = vector.shape_cast %30 : vector<1x96x32xbf16> to vector<96x32xbf16>
    %cst_18 = arith.constant dense<0.000000e+00> : vector<256x32xf32>
    %32 = tpu.matmul %29, %31, %cst_18 {dimension_numbers = #tpu.dot_dimension_numbers<[1], [0], [0], [1], [0, 0, 1, 1], [], []>} : vector<256x96xbf16>, vector<96x32xbf16>, vector<256x32xf32> -> vector<256x32xf32>
    %33 = arith.addf %23, %32 : vector<256x32xf32>
    %c0_19 = arith.constant 0 : index
    %c0_20 = arith.constant 0 : index
    %c0_21 = arith.constant 0 : index
    %34 = vector.load %arg4[%c0_19, %c0_20, %c0_21] : memref<1x256x32xf32, #tpu.memory_space<vmem>>, vector<1x256x32xf32>
    %35 = vector.shape_cast %34 : vector<1x256x32xf32> to vector<256x32xf32>
    %36 = vector.shape_cast %33 : vector<256x32xf32> to vector<1x256x32xf32>
    tpu.vector_store %arg4[%c0_19, %c0_20, %c0_21], %36 {strides = array<i32>} : memref<1x256x32xf32, #tpu.memory_space<vmem>>, vector<1x256x32xf32>,
    %c0_22 = arith.constant 0 : index
    %c0_23 = arith.constant 0 : index
    %c0_24 = arith.constant 0 : index
    %37 = vector.load %arg5[%c0_22, %c0_23, %c0_24] : memref<1x8x32xf32, #tpu.memory_space<vmem>>, vector<1x1x32xf32>
    %38 = vector.shape_cast %37 : vector<1x1x32xf32> to vector<1x32xf32>
    %cst_25 = arith.constant dense<0.000000e+00> : vector<32xf32>
    %39 = vector.multi_reduction <add>, %33, %cst_25 [0] : vector<256x32xf32> to vector<32xf32>
    %40 = vector.shape_cast %39 : vector<32xf32> to vector<1x32xf32>
    %41 = arith.addf %38, %40 : vector<1x32xf32>
    %c0_26 = arith.constant 0 : index
    %c0_27 = arith.constant 0 : index
    %c0_28 = arith.constant 0 : index
    %42 = vector.load %arg5[%c0_26, %c0_27, %c0_28] : memref<1x8x32xf32, #tpu.memory_space<vmem>>, vector<1x1x32xf32>
    %43 = vector.shape_cast %42 : vector<1x1x32xf32> to vector<1x32xf32>
    %44 = vector.shape_cast %41 : vector<1x32xf32> to vector<1x1x32xf32>
    tpu.vector_store %arg5[%c0_26, %c0_27, %c0_28], %44 {strides = array<i32>} : memref<1x8x32xf32, #tpu.memory_space<vmem>>, vector<1x1x32xf32>,
    %c0_29 = arith.constant 0 : index
    %c1_30 = arith.constant 1 : index
    %c0_31 = arith.constant 0 : index
    %45 = vector.load %arg5[%c0_29, %c1_30, %c0_31] : memref<1x8x32xf32, #tpu.memory_space<vmem>>, vector<1x1x32xf32>
    %46 = vector.shape_cast %45 : vector<1x1x32xf32> to vector<1x32xf32>
    %47 = arith.mulf %33, %33 : vector<256x32xf32>
    %cst_32 = arith.constant dense<0.000000e+00> : vector<32xf32>
    %48 = vector.multi_reduction <add>, %47, %cst_32 [0] : vector<256x32xf32> to vector<32xf32>
    %49 = vector.shape_cast %48 : vector<32xf32> to vector<1x32xf32>
    %50 = arith.addf %46, %49 : vector<1x32xf32>
    %c0_33 = arith.constant 0 : index
    %c1_34 = arith.constant 1 : index
    %c0_35 = arith.constant 0 : index
    %51 = vector.load %arg5[%c0_33, %c1_34, %c0_35] : memref<1x8x32xf32, #tpu.memory_space<vmem>>, vector<1x1x32xf32>
    %52 = vector.shape_cast %51 : vector<1x1x32xf32> to vector<1x32xf32>
    %53 = vector.shape_cast %50 : vector<1x32xf32> to vector<1x1x32xf32>
    tpu.vector_store %arg5[%c0_33, %c1_34, %c0_35], %53 {strides = array<i32>} : memref<1x8x32xf32, #tpu.memory_space<vmem>>, vector<1x1x32xf32>,
    return
  }
  func.func @transform_0(%arg0: i32, %arg1: i32) -> (i32, i32, i32) {
    %c0_i32 = arith.constant 0 : i32
    %c0_i32_0 = arith.constant 0 : i32
    %c0_i32_1 = arith.constant 0 : i32
    return %arg0, %c0_i32, %c0_i32_0 : i32, i32, i32
  }
  func.func @transform_1(%arg0: i32, %arg1: i32) -> (i32, i32, i32) {
    %c0_i32 = arith.constant 0 : i32
    %c0_i32_0 = arith.constant 0 : i32
    %c0_i32_1 = arith.constant 0 : i32
    %c0_i32_2 = arith.constant 0 : i32
    return %c0_i32, %c0_i32_0, %c0_i32_1 : i32, i32, i32
  }
  func.func @transform_2(%arg0: i32, %arg1: i32) -> (i32, i32, i32) {
    %c0_i32 = arith.constant 0 : i32
    %c0_i32_0 = arith.constant 0 : i32
    return %arg0, %arg1, %c0_i32 : i32, i32, i32
  }
  func.func @transform_3(%arg0: i32, %arg1: i32) -> (i32, i32, i32) {
    %c0_i32 = arith.constant 0 : i32
    %c0_i32_0 = arith.constant 0 : i32
    %c0_i32_1 = arith.constant 0 : i32
    return %arg0, %c0_i32, %c0_i32_0 : i32, i32, i32
  }
}

module attributes {stable_mosaic.version = 11 : i64} {
  func.func @_bn_lrelu_kernel(%arg0: i32, %arg1: memref<64x128xf32, #tpu.memory_space<vmem>>, %arg2: memref<1x128xf32, #tpu.memory_space<vmem>>, %arg3: memref<1x128xf32, #tpu.memory_space<vmem>>, %arg4: memref<64x128xf32, #tpu.memory_space<vmem>>) attributes {dimension_semantics = [#tpu.dimension_semantics<parallel>], iteration_bounds = array<i64: 2>, scalar_prefetch = 0 : i64, scratch_operands = 0 : i64, tpu.core_type = #tpu.core_type<tc>, window_params = [{transform_indices = @transform_0, window_bounds = array<i64: 64, 128>}, {pipeline_mode = #tpu.pipeline_mode<synchronous>, transform_indices = @transform_1, window_bounds = array<i64: 1, 128>}, {pipeline_mode = #tpu.pipeline_mode<synchronous>, transform_indices = @transform_2, window_bounds = array<i64: 1, 128>}, {transform_indices = @transform_3, window_bounds = array<i64: 64, 128>}]} {
    %c0 = arith.constant 0 : index
    %c0_0 = arith.constant 0 : index
    %0 = vector.load %arg1[%c0, %c0_0] : memref<64x128xf32, #tpu.memory_space<vmem>>, vector<64x128xf32>
    %c0_1 = arith.constant 0 : index
    %c0_2 = arith.constant 0 : index
    %1 = vector.load %arg2[%c0_1, %c0_2] : memref<1x128xf32, #tpu.memory_space<vmem>>, vector<1x128xf32>
    %2 = vector.broadcast %1 : vector<1x128xf32> to vector<64x128xf32>
    %3 = arith.mulf %0, %2 : vector<64x128xf32>
    %c0_3 = arith.constant 0 : index
    %c0_4 = arith.constant 0 : index
    %4 = vector.load %arg3[%c0_3, %c0_4] : memref<1x128xf32, #tpu.memory_space<vmem>>, vector<1x128xf32>
    %5 = vector.broadcast %4 : vector<1x128xf32> to vector<64x128xf32>
    %6 = arith.addf %3, %5 : vector<64x128xf32>
    %cst = arith.constant 0.000000e+00 : f32
    %7 = vector.broadcast %cst : f32 to vector<64x128xf32>
    %8 = arith.cmpf ogt, %6, %7 : vector<64x128xf32>
    %cst_5 = arith.constant 0.00999999977 : f32
    %9 = vector.broadcast %cst_5 : f32 to vector<64x128xf32>
    %10 = arith.mulf %9, %6 : vector<64x128xf32>
    %11 = arith.select %8, %6, %10 : vector<64x128xi1>, vector<64x128xf32>
    %c0_6 = arith.constant 0 : index
    %c0_7 = arith.constant 0 : index
    %12 = vector.load %arg4[%c0_6, %c0_7] : memref<64x128xf32, #tpu.memory_space<vmem>>, vector<64x128xf32>
    tpu.vector_store %arg4[%c0_6, %c0_7], %11 {strides = array<i32>} : memref<64x128xf32, #tpu.memory_space<vmem>>, vector<64x128xf32>,
    return
  }
  func.func @transform_0(%arg0: i32) -> (i32, i32) {
    %c0_i32 = arith.constant 0 : i32
    %c0_i32_0 = arith.constant 0 : i32
    return %arg0, %c0_i32 : i32, i32
  }
  func.func @transform_1(%arg0: i32) -> (i32, i32) {
    %c0_i32 = arith.constant 0 : i32
    %c0_i32_0 = arith.constant 0 : i32
    %c0_i32_1 = arith.constant 0 : i32
    return %c0_i32, %c0_i32_0 : i32, i32
  }
  func.func @transform_2(%arg0: i32) -> (i32, i32) {
    %c0_i32 = arith.constant 0 : i32
    %c0_i32_0 = arith.constant 0 : i32
    %c0_i32_1 = arith.constant 0 : i32
    return %c0_i32, %c0_i32_0 : i32, i32
  }
  func.func @transform_3(%arg0: i32) -> (i32, i32) {
    %c0_i32 = arith.constant 0 : i32
    %c0_i32_0 = arith.constant 0 : i32
    return %arg0, %c0_i32 : i32, i32
  }
}

</mosaic_0001>

<bundles_post_ra>
// kernel: tile.13
= control target key start
LH: loop header
LB: loop body
LE: loop exit
PB: predicated region body
PF: predicated region fallthrough
CT: control target
= control target key end

     0   :  { %s22_s0 = inlined_call_operand.vmem [shape: f32[32], index: 0, kind: input, shape index: {}]   ;;  %s23_s1 = inlined_call_operand.vmem [shape: f32[4,32], index: 1, kind: output, shape index: {}]  }
   0x1   :  { %v4_v0 = vld [vmem:[%s22_s0] ss:$0 sm:$0xff] }
   0x2   :  { %5 = vst [vmem:[%s23_s1] sm:$0xf] %v4_v0 }

// kernel: tile.14
= control target key start
LH: loop header
LB: loop body
LE: loop exit
PB: predicated region body
PF: predicated region fallthrough
CT: control target
= control target key end

     0   :  { %vm7_vm0 = vcmask 261120   ;;  %s37_s8 = smov 32   ;;  %s38_s9 = smov 64   ;;  %vm13_vm1 = vcmask 1048320   ;;  %vm19_vm2 = vcmask 785920   ;;  %vm25_vm3 = vcmask 523520   ;;  %s55_s0 = inlined_call_operand.vmem [shape: f32[4,32], index: 0, kind: input, shape index: {}]   ;;  %s56_s1 = inlined_call_operand.vmem [shape: f32[1,128], index: 1, kind: output, shape index: {}]  }
   0x1   :  { %v4_v0 = vld [vmem:[%s55_s0] sm:$0xf]  ;;  %s36_s0 = smov 96  }
   0x2   :  { %5 = vst [vmem:[#allocation1] sm:$0xf] %v4_v0 }
   0x9   :  { %v10_v1 = vld [vmem:[#allocation1 + $0x3] sm:$0x1]   ;;  %v22_v2 = vld [vmem:[#allocation1 + $0x1] sm:$0x1]   ;;  %v6_v3 = vld [vmem:[#allocation1] sm:$0x1]  }
   0xa   :  { %11 = vrot.lane.b32.xlu0 %v10_v1, %s36_s0  ;;  %23 = vrot.lane.b32.xlu1 %v22_v2, %s37_s8  ;;  %v16_v4 = vld [vmem:[#allocation1 + $0x2] sm:$0x1]   ;;  %8 = vst.msk [vmem:[#allocation0] sm:$0x1] %vm7_vm0, %v6_v3  }
   0xe   :  { %17 = vrot.lane.b32.xlu0 %v16_v4, %s38_s9 }
  0x7c   :  { %v12_v5 = vpop.permute.xlu0 %11   ;;  %v24_v6 = vpop.permute.xlu1 %23  }
  0x7d   :  { %14 = vst.msk [vmem:[#allocation0] sm:$0x1] %vm13_vm1, %v12_v5  }
  0x80   :  { %v18_v7 = vpop.permute.xlu0 %17  }
  0x81   :  { %20 = vst.msk [vmem:[#allocation0] sm:$0x1] %vm19_vm2, %v18_v7  }
  0x82   :  { %26 = vst.msk [vmem:[#allocation0] sm:$0x1] %vm25_vm3, %v24_v6  }
  0x89   :  { %v30_v8 = vld [vmem:[#allocation0] sm:$0x1] }
  0x8a   :  { %32 = vst [vmem:[%s56_s1] sm:$0x1] %v30_v8 }

// kernel: convblock_apply.3
= control target key start
LH: loop header
LB: loop body
LE: loop exit
PB: predicated region body
PF: predicated region fallthrough
CT: control target
= control target key end

     0   :  { %s2108_s12 = smov 0   ;;  %s2110_s13 = smov 0   ;;  %s2425_s0 = inlined_call_operand.vmem [shape: bf16[2,288,12], index: 0, kind: input, shape index: {}]   ;;  %s2426_s1 = inlined_call_operand.vmem [shape: bf16[3,12,32], index: 1, kind: input, shape index: {}]   ;;  %s2427_s2 = inlined_call_operand.vmem [shape: f32[2,256,32], index: 2, kind: output, shape index: {0}]   ;;  %s2428_s3 = inlined_call_operand.vmem [shape: f32[2,8,32], index: 3, kind: output, shape index: {1}]  }
   0x1   :  { %s2112_s14 = smov 0  }
   0x2 LB: > { %s26_s15 = sadd.s32 1, %s2081_s13  ;;  %p1588_p0 = scmp.ge.s32.totalorder %s2085_s14, 1  ;;  %s2085_s14 = sphi %s2112_s14, %s14_s14   ;;  %s2081_s13 = sphi %s2110_s13, %s2430_s13   ;;  %s2077_s12 = sphi %s2108_s12, %s2429_s12  }
   0x3   : > { %p28_p1 = scmp.ge.s32.totalorder %s26_s15, 2  ;;  %p154_p2 = scmp.lt.s32.totalorder %s2085_s14, 3 }
   0x5   : > { %s2432_s15 = smov (%p28_p1, %s26_s15), 0  ;;  %p155_p3 = pnand %p1588_p0, %p154_p2 }
   0x6   : > { %v2012_v0 = vld [vmem:[%s2426_s1 + $0x8] sm:$0x3f] (!%p155_p3)   ;;  %vm425_vm0 = vcmask (!%p155_p3), 1045504   ;;  %p186_p4 = scmp.lt.s32.totalorder (!%p155_p3), %s2077_s12, 1  ;;  %v2013_v1 = vld [vmem:[%s2426_s1] sm:$0x3f] (!%p155_p3)  }
   0x7   : > { %158 = sbr.rel (%p155_p3) target bundleno = 349 (0x15d), region = 28  ;;  %1982 = vmatprep.subr.msk.bf16.mxu1 (!%p155_p3), %vm425_vm0, %v2012_v0  ;;  %v427_v2 = vsel (!%p155_p3), %vm425_vm0, %v2012_v0, 0  ;;  %v2016_v3 = vld [vmem:[%s2426_s1 + $0x10] sm:$0x3f] (!%p155_p3)   ;;  %1983 = vmatprep.subr.msk.bf16.mxu0 (!%p155_p3), %vm425_vm0, %v2013_v1  ;;  %v724_v4 = vsel (!%p155_p3), %vm425_vm0, %v2013_v1, 0  ;;  %vm376_vm1 = vcmask (!%p155_p3), 97280  }
   0x8   : > { %1815 = vmatpush3.bf16.msra.mxu1 (!%p155_p3), %v427_v2  ;;  %1849 = vmatpush3.bf16.msra.mxu0 (!%p155_p3), %v724_v4  ;;  %v1061_v9 = vsel (!%p155_p3), %vm425_vm0, %v2016_v3, 0  ;;  %vm210_vm2 = vcmask (!%p155_p3), 261120   ;;  %v2087_v54 = vmov (!%p155_p3), 0.0   ;;  %vm1360_vm3 = vcmask (!%p155_p3), 253952  }
   0x9   : > { %1984 = vmatprep.subr.msk.bf16.mxu1 (!%p155_p3), %vm425_vm0, %v2013_v1  ;;  %1985 = vmatprep.subr.msk.bf16.mxu0 (!%p155_p3), %vm425_vm0, %v2016_v3 }
   0xe   : > { %s2434_s12 = smov (!%p186_p4, %s2077_s12), 1 }
   0xf   : > { %s1986_s22 = smul.u32 144, %s2434_s12  ;;  %s1592_s26 = sshll.u32 %s2434_s12, 3 }
  0x10   : > { %s2250_s29 = scalar_lea.vmem %s2428_s3, %s1592_s26  ;;  %s1762_s30 = sshll.u32 %s2434_s12, 8 }
  0x11   : > { %s2147_s25 = scalar_lea.vmem %s2425_s0, %s1986_s22  ;;  %211 = vst.msk [vmem:[%s2250_s29] sm:$0xff] %vm210_vm2, %v2087_v54  ;;  %s2274_s6 = scalar_lea.vmem %s2427_s2, %s1762_s30 }
  0x12   : > { %v2014_v5 = vld [vmem:[%s2147_s25 + $0x8] sm:$0xff]   ;;  %v2015_v6 = vld [vmem:[%s2147_s25] sm:$0xff]   ;;  %v2017_v7 = vld [vmem:[%s2147_s25 + $0x10] sm:$0xff]  }
  0x13   : > { %1816 = vmatprep.mubr.msk.bf16.mxu1 %vm376_vm1, %v2014_v5  ;;  %1850 = vmatprep.mubr.msk.bf16.mxu0 %vm376_vm1, %v2015_v6  ;;  %v2018_v8 = vld [vmem:[%s2147_s25 + $0x8] sm:$0xff]   ;;  %v2019_v10 = vld [vmem:[%s2147_s25 + $0x18] sm:$0xff]   ;;  %v2020_v11 = vld [vmem:[%s2147_s25 + $0x10] sm:$0xff]  }
  0x14   : > { %1817 = vmatmul.mubr.msk.bf16.vlgmr.msra.gmra.mrb[0].mxu1 %vm376_vm1, %v2017_v7  ;;  %1851 = vmatmul.mubr.msk.bf16.vlgmr.msra.gmra.mrb[0].mxu0 %vm376_vm1, %v2018_v8  ;;  %v2021_v12 = vld [vmem:[%s2147_s25 + $0x20] sm:$0xff]   ;;  %v2022_v13 = vld [vmem:[%s2147_s25 + $0x18] sm:$0xff]   ;;  %v2023_v14 = vld [vmem:[%s2147_s25 + $0x28] sm:$0xff]  }
  0x15   : > { %1917 = vmatpush3.bf16.msra.mxu1 %v724_v4  ;;  %1883 = vmatpush3.bf16.msra.mxu0 %v1061_v9  ;;  %v2024_v15 = vld [vmem:[%s2147_s25 + $0x20] sm:$0xff]   ;;  %v2025_v16 = vld [vmem:[%s2147_s25 + $0x30] sm:$0xff]   ;;  %v2026_v17 = vld [vmem:[%s2147_s25 + $0x28] sm:$0xff]  }
  0x16   : > { %1820 = vmatprep.mubr.msk.bf16.mxu1 %vm376_vm1, %v2019_v10  ;;  %1854 = vmatprep.mubr.msk.bf16.mxu0 %vm376_vm1, %v2020_v11  ;;  %v2027_v18 = vld [vmem:[%s2147_s25 + $0x38] sm:$0xff]   ;;  %v2028_v19 = vld [vmem:[%s2147_s25 + $0x30] sm:$0xff]   ;;  %v2029_v20 = vld [vmem:[%s2147_s25 + $0x40] sm:$0xff]  }
  0x17   : > { %v2030_v21 = vld [vmem:[%s2147_s25 + $0x38] sm:$0xff]   ;;  %v2031_v22 = vld [vmem:[%s2147_s25 + $0x48] sm:$0xff]   ;;  %v2032_v23 = vld [vmem:[%s2147_s25 + $0x10] sm:$0xff]  }
  0x18   : > { %v2033_v24 = vld [vmem:[%s2147_s25 + $0x50] sm:$0xff]   ;;  %v2034_v25 = vld [vmem:[%s2147_s25 + $0x18] sm:$0xff]   ;;  %v2036_v27 = vld [vmem:[%s2147_s25 + $0x20] sm:$0xff]  }
  0x19   : > { %v2035_v26 = vld [vmem:[%s2147_s25 + $0x58] sm:$0xff]   ;;  %v2037_v28 = vld [vmem:[%s2147_s25 + $0x60] sm:$0xff]   ;;  %v2038_v29 = vld [vmem:[%s2147_s25 + $0x28] sm:$0xff]  }
  0x1a   : > { %v2039_v30 = vld [vmem:[%s2147_s25 + $0x68] sm:$0xff]   ;;  %v2040_v31 = vld [vmem:[%s2147_s25 + $0x30] sm:$0xff]   ;;  %v2042_v33 = vld [vmem:[%s2147_s25 + $0x38] sm:$0xff]  }
  0x1b   : > { %v2041_v32 = vld [vmem:[%s2147_s25 + $0x70] sm:$0xff]   ;;  %v2043_v34 = vld [vmem:[%s2147_s25 + $0x78] sm:$0xff]   ;;  %v2044_v35 = vld [vmem:[%s2147_s25 + $0x40] sm:$0xff]  }
  0x1c   : > { %1821 = vmatmul.mubr.msk.bf16.gmra.mrb[4].mxu1 %vm376_vm1, %v2021_v12  ;;  %1855 = vmatmul.mubr.msk.bf16.gmra.mrb[4].mxu0 %vm376_vm1, %v2022_v13  ;;  %v2045_v36 = vld [vmem:[%s2147_s25 + $0x80] sm:$0xff]   ;;  %v2046_v37 = vld [vmem:[%s2147_s25 + $0x48] sm:$0xff]   ;;  %v2048_v39 = vld [vmem:[%s2147_s25 + $0x50] sm:$0xff]  }
  0x1d   : > { %1824 = vmatprep.mubr.msk.bf16.mxu1 %vm376_vm1, %v2023_v14  ;;  %1858 = vmatprep.mubr.msk.bf16.mxu0 %vm376_vm1, %v2024_v15  ;;  %v2047_v38 = vld [vmem:[%s2147_s25 + $0x40] sm:$0xff]   ;;  %v2049_v40 = vld [vmem:[%s2147_s25 + $0x48] sm:$0xff]   ;;  %v2050_v41 = vld [vmem:[%s2147_s25 + $0x58] sm:$0xff]  }
  0x1e   : > { %v2051_v42 = vld [vmem:[%s2147_s25 + $0x50] sm:$0xff]   ;;  %v2052_v43 = vld [vmem:[%s2147_s25 + $0x60] sm:$0xff]   ;;  %v2053_v44 = vld [vmem:[%s2147_s25 + $0x58] sm:$0xff]  }
  0x1f   : > { %v2054_v45 = vld [vmem:[%s2147_s25 + $0x68] sm:$0xff]   ;;  %v2055_v46 = vld [vmem:[%s2147_s25 + $0x60] sm:$0xff]   ;;  %v2056_v47 = vld [vmem:[%s2147_s25 + $0x70] sm:$0xff]  }
  0x20   : > { %v2057_v48 = vld [vmem:[%s2147_s25 + $0x68] sm:$0xff]   ;;  %v2058_v49 = vld [vmem:[%s2147_s25 + $0x78] sm:$0xff]   ;;  %v2059_v50 = vld [vmem:[%s2147_s25 + $0x70] sm:$0xff]  }
  0x21   : > { %v2060_v51 = vld [vmem:[%s2147_s25 + $0x80] sm:$0xff]   ;;  %v2061_v52 = vld [vmem:[%s2147_s25 + $0x78] sm:$0xff]   ;;  %v2062_v53 = vld [vmem:[%s2147_s25 + $0x88] sm:$0xff]  }
  0x24   : > { %1825 = vmatmul.mubr.msk.bf16.gmra.mrb[8].mxu1 %vm376_vm1, %v2025_v16  ;;  %1859 = vmatmul.mubr.msk.bf16.gmra.mrb[8].mxu0 %vm376_vm1, %v2026_v17 }
  0x25   : > { %1828 = vmatprep.mubr.msk.bf16.mxu1 %vm376_vm1, %v2027_v18  ;;  %1862 = vmatprep.mubr.msk.bf16.mxu0 %vm376_vm1, %v2028_v19 }
  0x2c   : > { %1829 = vmatmul.mubr.msk.bf16.gmra.mrb[12].mxu1 %vm376_vm1, %v2029_v20  ;;  %1863 = vmatmul.mubr.msk.bf16.gmra.mrb[12].mxu0 %vm376_vm1, %v2030_v21 }
  0x2d   : > { %1832 = vmatprep.mubr.msk.bf16.mxu1 %vm376_vm1, %v2031_v22  ;;  %1884 = vmatprep.mubr.msk.bf16.mxu0 %vm376_vm1, %v2032_v23 }
  0x34   : > { %1833 = vmatmul.mubr.msk.bf16.gmra.mrb[16].mxu1 %vm376_vm1, %v2033_v24  ;;  %1885 = vmatmul.mubr.msk.bf16.vlgmr.msra.gmra.mrb[0].mxu0 %vm376_vm1, %v2034_v25 }
  0x35   : > { %1836 = vmatprep.mubr.msk.bf16.mxu1 %vm376_vm1, %v2035_v26  ;;  %1888 = vmatprep.mubr.msk.bf16.mxu0 %vm376_vm1, %v2036_v27 }
  0x3c   : > { %1837 = vmatmul.mubr.msk.bf16.gmra.mrb[20].mxu1 %vm376_vm1, %v2037_v28  ;;  %1889 = vmatmul.mubr.msk.bf16.gmra.mrb[4].mxu0 %vm376_vm1, %v2038_v29 }
  0x3d   : > { %1840 = vmatprep.mubr.msk.bf16.mxu1 %vm376_vm1, %v2039_v30  ;;  %1892 = vmatprep.mubr.msk.bf16.mxu0 %vm376_vm1, %v2040_v31 }
  0x44   : > { %1841 = vmatmul.mubr.msk.bf16.gmra.mrb[24].mxu1 %vm376_vm1, %v2041_v32  ;;  %1893 = vmatmul.mubr.msk.bf16.gmra.mrb[8].mxu0 %vm376_vm1, %v2042_v33 }
  0x45   : > { %1844 = vmatprep.mubr.msk.bf16.mxu1 %vm376_vm1, %v2043_v34  ;;  %1896 = vmatprep.mubr.msk.bf16.mxu0 %vm376_vm1, %v2044_v35 }
  0x4c   : > { %1845 = vmatmul.mubr.msk.bf16.gmra.mrb[28].mxu1 %vm376_vm1, %v2045_v36  ;;  %1897 = vmatmul.mubr.msk.bf16.gmra.mrb[12].mxu0 %vm376_vm1, %v2046_v37 }
  0x4d   : > { %1866 = vmatprep.mubr.msk.bf16.mxu1 %vm376_vm1, %v2047_v38  ;;  %1900 = vmatprep.mubr.msk.bf16.mxu0 %vm376_vm1, %v2048_v39 }
  0x54   : > { %1867 = vmatmul.mubr.msk.bf16.vlgmr.msra.gmra.mrb[16].mxu1 %vm376_vm1, %v2049_v40  ;;  %1901 = vmatmul.mubr.msk.bf16.gmra.mrb[16].mxu0 %vm376_vm1, %v2050_v41 }
  0x55   : > { %1870 = vmatprep.mubr.msk.bf16.mxu1 %vm376_vm1, %v2051_v42  ;;  %1904 = vmatprep.mubr.msk.bf16.mxu0 %vm376_vm1, %v2052_v43 }
  0x5c   : > { %1871 = vmatmul.mubr.msk.bf16.gmra.mrb[20].mxu1 %vm376_vm1, %v2053_v44  ;;  %1905 = vmatmul.mubr.msk.bf16.gmra.mrb[20].mxu0 %vm376_vm1, %v2054_v45 }
  0x5d   : > { %1874 = vmatprep.mubr.msk.bf16.mxu1 %vm376_vm1, %v2055_v46  ;;  %1908 = vmatprep.mubr.msk.bf16.mxu0 %vm376_vm1, %v2056_v47 }
  0x64   : > { %1875 = vmatmul.mubr.msk.bf16.gmra.mrb[24].mxu1 %vm376_vm1, %v2057_v48  ;;  %1909 = vmatmul.mubr.msk.bf16.gmra.mrb[24].mxu0 %vm376_vm1, %v2058_v49 }
  0x65   : > { %1878 = vmatprep.mubr.msk.bf16.mxu1 %vm376_vm1, %v2059_v50  ;;  %1912 = vmatprep.mubr.msk.bf16.mxu0 %vm376_vm1, %v2060_v51 }
  0x6c   : > { %1879 = vmatmul.mubr.msk.bf16.gmra.mrb[28].mxu1 %vm376_vm1, %v2061_v52  ;;  %1913 = vmatmul.mubr.msk.bf16.gmra.mrb[28].mxu0 %vm376_vm1, %v2062_v53 }
  0xe7   : > { %v1818_v55 = vpop.f32.mrb[0].mxu1 }
  0xe8   : > { %v463_v56 = vpop.f32.mrb[1].mxu1 }
  0xe9   : > { %v1819_v57 = vpop.f32.mrb[2].mxu1 }
  0xea   : > { %v466_v58 = vpop.f32.mrb[3].mxu1 }
  0xef   : > { %v1822_v59 = vpop.f32.mrb[4].mxu1 }
  0xf0   : > { %v479_v60 = vpop.f32.mrb[5].mxu1 }
  0xf1   : > { %v1823_v61 = vpop.f32.mrb[6].mxu1 }
  0xf2   : > { %v482_v62 = vpop.f32.mrb[7].mxu1 }
  0xf7   : > { %v2254_v63 = vpop.f32.mrb[8].mxu1 }
  0xf8   : > { %v2256_v0 = vpop.f32.mrb[9].mxu1 }
  0xf9   : > { %v2258_v1 = vpop.f32.mrb[10].mxu1 }
  0xfa   : > { %v2260_v2 = vpop.f32.mrb[11].mxu1 }
  0xff   : > { %v2262_v3 = vpop.f32.mrb[12].mxu1 }
 0x100   : > { %v2264_v4 = vpop.f32.mrb[13].mxu1 }
 0x101   : > { %v2266_v5 = vpop.f32.mrb[14].mxu1 }
 0x102   : > { %v2268_v6 = vpop.f32.mrb[15].mxu1 }
 0x107   : > { %v1886_v7 = vpop.f32.mrb[0].mxu0 }
 0x108   : > { %v1918_v8 = vadd.f32 %v1886_v7, %v1818_v55  ;;  %v1097_v9 = vpop.f32.mrb[1].mxu0 }
 0x109   : > { %v1919_v10 = vadd.f32 %v1097_v9, %v463_v56  ;;  %v1887_v11 = vpop.f32.mrb[2].mxu0 }
 0x10a   : > { %1259 = vst.msk [vmem:[%s2274_s6 + $0x10] sm:$0xff] %vm210_vm2, %v1918_v8  ;;  %v1920_v12 = vadd.f32 %v1887_v11, %v1819_v57  ;;  %v1100_v13 = vpop.f32.mrb[3].mxu0  ;;  %v1365_v16 = vmul.f32 %v1918_v8, %v1918_v8  ;;  %v1293_v22 = vsel %vm210_vm2, %v1918_v8, 0.0 }
 0x10b   : > { %1257 = vst.msk [vmem:[%s2274_s6] sm:$0xff] %vm210_vm2, %v1919_v10  ;;  %v1363_v14 = vmul.f32 %v1919_v10, %v1919_v10  ;;  %v1921_v15 = vadd.f32 %v1100_v13, %v466_v58  ;;  %v1290_v17 = vsel %vm210_vm2, %v1919_v10, 0.0 }
 0x10c   : > { %1260 = vst.msk [vmem:[%s2274_s6 + $0x18] sm:$0xff] %vm210_vm2, %v1920_v12  ;;  %v1366_v20 = vmul.f32 %v1920_v12, %v1920_v12  ;;  %v1398_v30 = vsel %vm210_vm2, %v1365_v16, 0.0  ;;  %v1295_v31 = vsel %vm210_vm2, %v1920_v12, 0.0 }
 0x10d   : > { %1258 = vst.msk [vmem:[%s2274_s6 + $0x8] sm:$0xff] %vm210_vm2, %v1921_v15  ;;  %v1291_v18 = vsel %vm210_vm2, %v1921_v15, 0.0  ;;  %v1364_v19 = vmul.f32 %v1921_v15, %v1921_v15  ;;  %v1395_v23 = vsel %vm210_vm2, %v1363_v14, 0.0 }
 0x10e   : > { %v1292_v21 = vadd.f32 %v1291_v18, %v1290_v17  ;;  %v1400_v34 = vsel %vm210_vm2, %v1366_v20, 0.0 }
 0x10f   : > { %v1396_v24 = vsel %vm210_vm2, %v1364_v19, 0.0  ;;  %v1890_v25 = vpop.f32.mrb[4].mxu0 }
 0x110   : > { %v1294_v26 = vadd.f32 %v1293_v22, %v1292_v21  ;;  %v1397_v27 = vadd.f32 %v1396_v24, %v1395_v23  ;;  %v1922_v28 = vadd.f32 %v1890_v25, %v1822_v59  ;;  %v1113_v29 = vpop.f32.mrb[5].mxu0 }
 0x111   : > { %v1923_v32 = vadd.f32 %v1113_v29, %v479_v60  ;;  %v1891_v33 = vpop.f32.mrb[6].mxu0 }
 0x112   : > { %v1399_v35 = vadd.f32 %v1398_v30, %v1397_v27  ;;  %1263 = vst.msk [vmem:[%s2274_s6 + $0x30] sm:$0xff] %vm210_vm2, %v1922_v28  ;;  %v1296_v36 = vadd.f32 %v1295_v31, %v1294_v26  ;;  %v1116_v37 = vpop.f32.mrb[7].mxu0  ;;  %v1924_v40 = vadd.f32 %v1891_v33, %v1823_v61  ;;  %v1369_v46 = vmul.f32 %v1922_v28, %v1922_v28 }
 0x113   : > { %1261 = vst.msk [vmem:[%s2274_s6 + $0x20] sm:$0xff] %vm210_vm2, %v1923_v32  ;;  %v1297_v38 = vsel %vm210_vm2, %v1923_v32, 0.0  ;;  %v1367_v39 = vmul.f32 %v1923_v32, %v1923_v32  ;;  %v1925_v41 = vadd.f32 %v1116_v37, %v482_v62  ;;  %v1301_v50 = vsel %vm210_vm2, %v1922_v28, 0.0 }
 0x114   : > { %v1298_v42 = vadd.f32 %v1297_v38, %v1296_v36  ;;  %v1401_v43 = vadd.f32 %v1400_v34, %v1399_v35  ;;  %1264 = vst.msk [vmem:[%s2274_s6 + $0x38] sm:$0xff] %vm210_vm2, %v1924_v40  ;;  %v1370_v52 = vmul.f32 %v1924_v40, %v1924_v40  ;;  %v1303_v57 = vsel %vm210_vm2, %v1924_v40, 0.0 }
 0x115   : > { %v1402_v44 = vsel %vm210_vm2, %v1367_v39, 0.0  ;;  %1262 = vst.msk [vmem:[%s2274_s6 + $0x28] sm:$0xff] %vm210_vm2, %v1925_v41  ;;  %v1299_v45 = vsel %vm210_vm2, %v1925_v41, 0.0  ;;  %v1368_v49 = vmul.f32 %v1925_v41, %v1925_v41  ;;  %v1406_v61 = vsel %vm210_vm2, %v1369_v46, 0.0 }
 0x116   : > { %v1403_v47 = vadd.f32 %v1402_v44, %v1401_v43  ;;  %v1300_v48 = vadd.f32 %v1299_v45, %v1298_v42 }
 0x117   : > { %v1894_v51 = vpop.f32.mrb[8].mxu0  ;;  %v1404_v54 = vsel %vm210_vm2, %v1368_v49, 0.0 }
 0x118   : > { %v1302_v53 = vadd.f32 %v1301_v50, %v1300_v48  ;;  %v1926_v55 = vadd.f32 %v1894_v51, %v2254_v63  ;;  %v1129_v56 = vpop.f32.mrb[9].mxu0  ;;  %v1405_v58 = vadd.f32 %v1404_v54, %v1403_v47 }
 0x119   : > { %v1927_v59 = vadd.f32 %v1129_v56, %v2256_v0  ;;  %v1895_v60 = vpop.f32.mrb[10].mxu0  ;;  %v1408_v0 = vsel %vm210_vm2, %v1370_v52, 0.0 }
 0x11a   : > { %1267 = vst.msk [vmem:[%s2274_s6 + $0x50] sm:$0xff] %vm210_vm2, %v1926_v55  ;;  %v1304_v62 = vadd.f32 %v1303_v57, %v1302_v53  ;;  %v1928_v7 = vadd.f32 %v1895_v60, %v2258_v1  ;;  %v1132_v8 = vpop.f32.mrb[11].mxu0  ;;  %v1407_v9 = vadd.f32 %v1406_v61, %v1405_v58  ;;  %v1373_v16 = vmul.f32 %v1926_v55, %v1926_v55 }
 0x11b   : > { %1265 = vst.msk [vmem:[%s2274_s6 + $0x40] sm:$0xff] %vm210_vm2, %v1927_v59  ;;  %v1305_v63 = vsel %vm210_vm2, %v1927_v59, 0.0  ;;  %v1371_v10 = vmul.f32 %v1927_v59, %v1927_v59  ;;  %v1929_v11 = vadd.f32 %v1132_v8, %v2260_v2  ;;  %v1309_v18 = vsel %vm210_vm2, %v1926_v55, 0.0 }
 0x11c   : > { %v1306_v12 = vadd.f32 %v1305_v63, %v1304_v62  ;;  %1268 = vst.msk [vmem:[%s2274_s6 + $0x58] sm:$0xff] %vm210_vm2, %v1928_v7  ;;  %v1409_v13 = vadd.f32 %v1408_v0, %v1407_v9  ;;  %v1374_v21 = vmul.f32 %v1928_v7, %v1928_v7  ;;  %v1311_v25 = vsel %vm210_vm2, %v1928_v7, 0.0 }
 0x11d   : > { %v1410_v14 = vsel %vm210_vm2, %v1371_v10, 0.0  ;;  %1266 = vst.msk [vmem:[%s2274_s6 + $0x48] sm:$0xff] %vm210_vm2, %v1929_v11  ;;  %v1307_v1 = vsel %vm210_vm2, %v1929_v11, 0.0  ;;  %v1372_v15 = vmul.f32 %v1929_v11, %v1929_v11  ;;  %v1414_v29 = vsel %vm210_vm2, %v1373_v16, 0.0 }
 0x11e   : > { %v1308_v17 = vadd.f32 %v1307_v1, %v1306_v12  ;;  %v1411_v19 = vadd.f32 %v1410_v14, %v1409_v13 }
 0x11f   : > { %v1412_v2 = vsel %vm210_vm2, %v1372_v15, 0.0  ;;  %v1898_v20 = vpop.f32.mrb[12].mxu0 }
 0x120   : > { %v1310_v22 = vadd.f32 %v1309_v18, %v1308_v17  ;;  %v1930_v23 = vadd.f32 %v1898_v20, %v2262_v3  ;;  %v1145_v24 = vpop.f32.mrb[13].mxu0  ;;  %v1413_v26 = vadd.f32 %v1412_v2, %v1411_v19 }
 0x121   : > { %v1931_v27 = vadd.f32 %v1145_v24, %v2264_v4  ;;  %v1899_v28 = vpop.f32.mrb[14].mxu0  ;;  %v1416_v4 = vsel %vm210_vm2, %v1374_v21, 0.0 }
 0x122   : > { %1271 = vst.msk [vmem:[%s2274_s6 + $0x70] sm:$0xff] %vm210_vm2, %v1930_v23  ;;  %v1312_v30 = vadd.f32 %v1311_v25, %v1310_v22  ;;  %v1932_v31 = vadd.f32 %v1899_v28, %v2266_v5  ;;  %v1148_v32 = vpop.f32.mrb[15].mxu0  ;;  %v1415_v33 = vadd.f32 %v1414_v29, %v1413_v26  ;;  %v1377_v40 = vmul.f32 %v1930_v23, %v1930_v23 }
 0x123   : > { %1269 = vst.msk [vmem:[%s2274_s6 + $0x60] sm:$0xff] %vm210_vm2, %v1931_v27  ;;  %v1313_v3 = vsel %vm210_vm2, %v1931_v27, 0.0  ;;  %v1375_v34 = vmul.f32 %v1931_v27, %v1931_v27  ;;  %v1933_v35 = vadd.f32 %v1148_v32, %v2268_v6  ;;  %v1317_v43 = vsel %vm210_vm2, %v1930_v23, 0.0 }
 0x124   : > { %v1314_v36 = vadd.f32 %v1313_v3, %v1312_v30  ;;  %1272 = vst.msk [vmem:[%s2274_s6 + $0x78] sm:$0xff] %vm210_vm2, %v1932_v31  ;;  %v1417_v37 = vadd.f32 %v1416_v4, %v1415_v33  ;;  %v1378_v47 = vmul.f32 %v1932_v31, %v1932_v31  ;;  %v1319_v52 = vsel %vm210_vm2, %v1932_v31, 0.0 }
 0x125   : > { %v1418_v38 = vsel %vm210_vm2, %v1375_v34, 0.0  ;;  %1270 = vst.msk [vmem:[%s2274_s6 + $0x68] sm:$0xff] %vm210_vm2, %v1933_v35  ;;  %v1315_v5 = vsel %vm210_vm2, %v1933_v35, 0.0  ;;  %v1376_v39 = vmul.f32 %v1933_v35, %v1933_v35  ;;  %v1422_v57 = vsel %vm210_vm2, %v1377_v40, 0.0 }
 0x126   : > { %v1316_v41 = vadd.f32 %v1315_v5, %v1314_v36  ;;  %v1419_v6 = vadd.f32 %v1418_v38, %v1417_v37  ;;  %v1424_v9 = vsel %vm210_vm2, %v1378_v47, 0.0 }
 0x127   : > { %v1868_v42 = vpop.f32.mrb[16].mxu1  ;;  %v1420_v44 = vsel %vm210_vm2, %v1376_v39, 0.0  ;;  %v1902_v45 = vpop.f32.mrb[16].mxu0 }
 0x128   : > { %v824_v46 = vpop.f32.mrb[17].mxu1  ;;  %v1318_v48 = vadd.f32 %v1317_v43, %v1316_v41  ;;  %v1934_v49 = vadd.f32 %v1902_v45, %v1868_v42  ;;  %v1161_v50 = vpop.f32.mrb[17].mxu0  ;;  %v1421_v53 = vadd.f32 %v1420_v44, %v1419_v6 }
 0x129   : > { %v1869_v51 = vpop.f32.mrb[18].mxu1  ;;  %v1935_v54 = vadd.f32 %v1161_v50, %v824_v46  ;;  %v1903_v55 = vpop.f32.mrb[18].mxu0 }
 0x12a   : > { %v827_v56 = vpop.f32.mrb[19].mxu1  ;;  %1275 = vst.msk [vmem:[%s2274_s6 + $0x90] sm:$0xff] %vm210_vm2, %v1934_v49  ;;  %v1320_v58 = vadd.f32 %v1319_v52, %v1318_v48  ;;  %v1936_v59 = vadd.f32 %v1903_v55, %v1869_v51  ;;  %v1164_v60 = vpop.f32.mrb[19].mxu0  ;;  %v1423_v61 = vadd.f32 %v1422_v57, %v1421_v53  ;;  %v1381_v13 = vmul.f32 %v1934_v49, %v1934_v49 }
 0x12b   : > { %1273 = vst.msk [vmem:[%s2274_s6 + $0x80] sm:$0xff] %vm210_vm2, %v1935_v54  ;;  %v1321_v62 = vsel %vm210_vm2, %v1935_v54, 0.0  ;;  %v1379_v7 = vmul.f32 %v1935_v54, %v1935_v54  ;;  %v1937_v8 = vadd.f32 %v1164_v60, %v827_v56  ;;  %v1325_v15 = vsel %vm210_vm2, %v1934_v49, 0.0 }
 0x12c   : > { %v1322_v63 = vadd.f32 %v1321_v62, %v1320_v58  ;;  %1276 = vst.msk [vmem:[%s2274_s6 + $0x98] sm:$0xff] %vm210_vm2, %v1936_v59  ;;  %v1425_v10 = vadd.f32 %v1424_v9, %v1423_v61  ;;  %v1382_v2 = vmul.f32 %v1936_v59, %v1936_v59  ;;  %v1327_v24 = vsel %vm210_vm2, %v1936_v59, 0.0 }
 0x12d   : > { %v1426_v11 = vsel %vm210_vm2, %v1379_v7, 0.0  ;;  %1274 = vst.msk [vmem:[%s2274_s6 + $0x88] sm:$0xff] %vm210_vm2, %v1937_v8  ;;  %v1323_v0 = vsel %vm210_vm2, %v1937_v8, 0.0  ;;  %v1380_v12 = vmul.f32 %v1937_v8, %v1937_v8  ;;  %v1430_v29 = vsel %vm210_vm2, %v1381_v13, 0.0 }
 0x12e   : > { %v1324_v14 = vadd.f32 %v1323_v0, %v1322_v63  ;;  %v1427_v16 = vadd.f32 %v1426_v11, %v1425_v10  ;;  %v1432_v4 = vsel %vm210_vm2, %v1382_v2, 0.0 }
 0x12f   : > { %v1872_v1 = vpop.f32.mrb[20].mxu1  ;;  %v1428_v17 = vsel %vm210_vm2, %v1380_v12, 0.0  ;;  %v1906_v18 = vpop.f32.mrb[20].mxu0 }
 0x130   : > { %v840_v19 = vpop.f32.mrb[21].mxu1  ;;  %v1326_v20 = vadd.f32 %v1325_v15, %v1324_v14  ;;  %v1938_v21 = vadd.f32 %v1906_v18, %v1872_v1  ;;  %v1177_v22 = vpop.f32.mrb[21].mxu0  ;;  %v1429_v25 = vadd.f32 %v1428_v17, %v1427_v16 }
 0x131   : > { %v1873_v23 = vpop.f32.mrb[22].mxu1  ;;  %v1939_v26 = vadd.f32 %v1177_v22, %v840_v19  ;;  %v1907_v27 = vpop.f32.mrb[22].mxu0 }
 0x132   : > { %v843_v28 = vpop.f32.mrb[23].mxu1  ;;  %1279 = vst.msk [vmem:[%s2274_s6 + $0xb0] sm:$0xff] %vm210_vm2, %v1938_v21  ;;  %v1328_v30 = vadd.f32 %v1327_v24, %v1326_v20  ;;  %v1940_v31 = vadd.f32 %v1907_v27, %v1873_v23  ;;  %v1180_v32 = vpop.f32.mrb[23].mxu0  ;;  %v1431_v33 = vadd.f32 %v1430_v29, %v1429_v25  ;;  %v1385_v40 = vmul.f32 %v1938_v21, %v1938_v21 }
 0x133   : > { %1277 = vst.msk [vmem:[%s2274_s6 + $0xa0] sm:$0xff] %vm210_vm2, %v1939_v26  ;;  %v1329_v3 = vsel %vm210_vm2, %v1939_v26, 0.0  ;;  %v1383_v34 = vmul.f32 %v1939_v26, %v1939_v26  ;;  %v1941_v35 = vadd.f32 %v1180_v32, %v843_v28  ;;  %v1333_v43 = vsel %vm210_vm2, %v1938_v21, 0.0 }
 0x134   : > { %v1330_v36 = vadd.f32 %v1329_v3, %v1328_v30  ;;  %1280 = vst.msk [vmem:[%s2274_s6 + $0xb8] sm:$0xff] %vm210_vm2, %v1940_v31  ;;  %v1433_v37 = vadd.f32 %v1432_v4, %v1431_v33  ;;  %v1386_v47 = vmul.f32 %v1940_v31, %v1940_v31  ;;  %v1335_v52 = vsel %vm210_vm2, %v1940_v31, 0.0 }
 0x135   : > { %v1434_v38 = vsel %vm210_vm2, %v1383_v34, 0.0  ;;  %1278 = vst.msk [vmem:[%s2274_s6 + $0xa8] sm:$0xff] %vm210_vm2, %v1941_v35  ;;  %v1331_v5 = vsel %vm210_vm2, %v1941_v35, 0.0  ;;  %v1384_v39 = vmul.f32 %v1941_v35, %v1941_v35  ;;  %v1438_v57 = vsel %vm210_vm2, %v1385_v40, 0.0 }
 0x136   : > { %v1332_v41 = vadd.f32 %v1331_v5, %v1330_v36  ;;  %v1435_v6 = vadd.f32 %v1434_v38, %v1433_v37  ;;  %v1440_v9 = vsel %vm210_vm2, %v1386_v47, 0.0 }
 0x137   : > { %v1876_v42 = vpop.f32.mrb[24].mxu1  ;;  %v1436_v44 = vsel %vm210_vm2, %v1384_v39, 0.0  ;;  %v1910_v45 = vpop.f32.mrb[24].mxu0 }
 0x138   : > { %v856_v46 = vpop.f32.mrb[25].mxu1  ;;  %v1334_v48 = vadd.f32 %v1333_v43, %v1332_v41  ;;  %v1942_v49 = vadd.f32 %v1910_v45, %v1876_v42  ;;  %v1193_v50 = vpop.f32.mrb[25].mxu0  ;;  %v1437_v53 = vadd.f32 %v1436_v44, %v1435_v6 }
 0x139   : > { %v1877_v51 = vpop.f32.mrb[26].mxu1  ;;  %v1943_v54 = vadd.f32 %v1193_v50, %v856_v46  ;;  %v1911_v55 = vpop.f32.mrb[26].mxu0 }
 0x13a   : > { %v859_v56 = vpop.f32.mrb[27].mxu1  ;;  %1283 = vst.msk [vmem:[%s2274_s6 + $0xd0] sm:$0xff] %vm210_vm2, %v1942_v49  ;;  %v1336_v58 = vadd.f32 %v1335_v52, %v1334_v48  ;;  %v1944_v59 = vadd.f32 %v1911_v55, %v1877_v51  ;;  %v1196_v60 = vpop.f32.mrb[27].mxu0  ;;  %v1439_v61 = vadd.f32 %v1438_v57, %v1437_v53  ;;  %v1389_v13 = vmul.f32 %v1942_v49, %v1942_v49 }
 0x13b   : > { %1281 = vst.msk [vmem:[%s2274_s6 + $0xc0] sm:$0xff] %vm210_vm2, %v1943_v54  ;;  %v1337_v62 = vsel %vm210_vm2, %v1943_v54, 0.0  ;;  %v1387_v7 = vmul.f32 %v1943_v54, %v1943_v54  ;;  %v1945_v8 = vadd.f32 %v1196_v60, %v859_v56  ;;  %v1341_v15 = vsel %vm210_vm2, %v1942_v49, 0.0 }
 0x13c   : > { %v1338_v63 = vadd.f32 %v1337_v62, %v1336_v58  ;;  %1284 = vst.msk [vmem:[%s2274_s6 + $0xd8] sm:$0xff] %vm210_vm2, %v1944_v59  ;;  %v1441_v10 = vadd.f32 %v1440_v9, %v1439_v61  ;;  %v1390_v2 = vmul.f32 %v1944_v59, %v1944_v59  ;;  %v1343_v24 = vsel %vm210_vm2, %v1944_v59, 0.0  ;;  %v1289_v61 = vld [vmem:[%s2250_s29] sm:$0x1] }
 0x13d   : > { %v1442_v11 = vsel %vm210_vm2, %v1387_v7, 0.0  ;;  %1282 = vst.msk [vmem:[%s2274_s6 + $0xc8] sm:$0xff] %vm210_vm2, %v1945_v8  ;;  %v1339_v0 = vsel %vm210_vm2, %v1945_v8, 0.0  ;;  %v1388_v12 = vmul.f32 %v1945_v8, %v1945_v8  ;;  %v1446_v29 = vsel %vm210_vm2, %v1389_v13, 0.0 }
 0x13e   : > { %v1340_v14 = vadd.f32 %v1339_v0, %v1338_v63  ;;  %v1443_v16 = vadd.f32 %v1442_v11, %v1441_v10  ;;  %v1448_v4 = vsel %vm210_vm2, %v1390_v2, 0.0  ;;  %v1362_v63 = vld [vmem:[%s2250_s29 + $0x1] sm:$0x1] }
 0x13f   : > { %v1880_v1 = vpop.f32.mrb[28].mxu1  ;;  %v1444_v17 = vsel %vm210_vm2, %v1388_v12, 0.0  ;;  %v1914_v18 = vpop.f32.mrb[28].mxu0 }
 0x140   : > { %v872_v19 = vpop.f32.mrb[29].mxu1  ;;  %v1342_v20 = vadd.f32 %v1341_v15, %v1340_v14  ;;  %v1946_v21 = vadd.f32 %v1914_v18, %v1880_v1  ;;  %v1209_v22 = vpop.f32.mrb[29].mxu0  ;;  %v1445_v25 = vadd.f32 %v1444_v17, %v1443_v16 }
 0x141   : > { %v1881_v23 = vpop.f32.mrb[30].mxu1  ;;  %v1947_v26 = vadd.f32 %v1209_v22, %v872_v19  ;;  %v1915_v27 = vpop.f32.mrb[30].mxu0 }
 0x142   : > { %v875_v28 = vpop.f32.mrb[31].mxu1  ;;  %1287 = vst.msk [vmem:[%s2274_s6 + $0xf0] sm:$0xff] %vm210_vm2, %v1946_v21  ;;  %v1344_v30 = vadd.f32 %v1343_v24, %v1342_v20  ;;  %v1948_v31 = vadd.f32 %v1915_v27, %v1881_v23  ;;  %v1212_v32 = vpop.f32.mrb[31].mxu0  ;;  %v1447_v33 = vadd.f32 %v1446_v29, %v1445_v25  ;;  %v1393_v40 = vmul.f32 %v1946_v21, %v1946_v21 }
 0x143   : > { %1285 = vst.msk [vmem:[%s2274_s6 + $0xe0] sm:$0xff] %vm210_vm2, %v1947_v26  ;;  %v1345_v3 = vsel %vm210_vm2, %v1947_v26, 0.0  ;;  %v1391_v34 = vmul.f32 %v1947_v26, %v1947_v26  ;;  %v1949_v35 = vadd.f32 %v1212_v32, %v875_v28  ;;  %v1349_v42 = vsel %vm210_vm2, %v1946_v21, 0.0 }
 0x144   : > { %v1346_v36 = vadd.f32 %v1345_v3, %v1344_v30  ;;  %1288 = vst.msk [vmem:[%s2274_s6 + $0xf8] sm:$0xff] %vm210_vm2, %v1948_v31  ;;  %v1449_v37 = vadd.f32 %v1448_v4, %v1447_v33  ;;  %v1394_v44 = vmul.f32 %v1948_v31, %v1948_v31  ;;  %v1351_v46 = vsel %vm210_vm2, %v1948_v31, 0.0 }
 0x145   : > { %v1450_v38 = vsel %vm210_vm2, %v1391_v34, 0.0  ;;  %1286 = vst.msk [vmem:[%s2274_s6 + $0xe8] sm:$0xff] %vm210_vm2, %v1949_v35  ;;  %v1347_v5 = vsel %vm210_vm2, %v1949_v35, 0.0  ;;  %v1392_v39 = vmul.f32 %v1949_v35, %v1949_v35  ;;  %v1454_v48 = vsel %vm210_vm2, %v1393_v40, 0.0 }
 0x146   : > { %v1348_v41 = vadd.f32 %v1347_v5, %v1346_v36  ;;  %v1451_v43 = vadd.f32 %v1450_v38, %v1449_v37  ;;  %v1456_v51 = vsel %vm210_vm2, %v1394_v44, 0.0 }
 0x147   : > { %v1452_v6 = vsel %vm210_vm2, %v1392_v39, 0.0 }
 0x148   : > { %v1350_v45 = vadd.f32 %v1349_v42, %v1348_v41  ;;  %v1453_v47 = vadd.f32 %v1452_v6, %v1451_v43 }
 0x14a   : > { %v1352_v49 = vadd.f32 %v1351_v46, %v1350_v45  ;;  %v1455_v50 = vadd.f32 %v1454_v48, %v1453_v47 }
 0x14c   : > { %v1353_v52 = vrot.slane %v1352_v49, 4  ;;  %v1457_v53 = vadd.f32 %v1456_v51, %v1455_v50 }
 0x14e   : > { %v1354_v54 = vadd.f32 %v1353_v52, %v1352_v49  ;;  %v1458_v55 = vrot.slane %v1457_v53, 4 }
 0x150   : > { %v1355_v56 = vrot.slane %v1354_v54, 2  ;;  %v1459_v57 = vadd.f32 %v1458_v55, %v1457_v53 }
 0x152   : > { %v1356_v58 = vadd.f32 %v1355_v56, %v1354_v54  ;;  %v1460_v59 = vrot.slane %v1459_v57, 2 }
 0x154   : > { %v1357_v60 = vrot.slane %v1356_v58, 1  ;;  %v1461_v62 = vadd.f32 %v1460_v59, %v1459_v57 }
 0x156   : > { %v1358_v7 = vadd.f32 %v1357_v60, %v1356_v58  ;;  %v1462_v8 = vrot.slane %v1461_v62, 1 }
 0x158   : > { %v1359_v9 = vadd.f32 %v1358_v7, %v1289_v61  ;;  %v1463_v10 = vadd.f32 %v1462_v8, %v1461_v62 }
 0x15a   : > { %1361 = vst.msk [vmem:[%s2250_s29] sm:$0x1] %vm1360_vm3, %v1359_v9  ;;  %v1464_v11 = vadd.f32 %v1463_v10, %v1362_v63 }
 0x15c   : > { %1465 = vst.msk [vmem:[%s2250_s29 + $0x1] sm:$0x1] %vm1360_vm3, %v1464_v11 }
 0x15d PF: > { %s14_s14 = sadd.s32 1, %s2085_s14   ;;  %s2429_s12 = smov %s2081_s13 }
 0x15e   : > { %p11_p5 = scmp.ge.s32.totalorder %s14_s14, 4   ;;  %s2430_s13 = smov %s2432_s15 }
 0x160   :  { %13 = sbr.rel (!%p11_p5) target bundleno = 2 (0x2), region = 79 }

// kernel: convblock_apply.5
= control target key start
LH: loop header
LB: loop body
LE: loop exit
PB: predicated region body
PF: predicated region fallthrough
CT: control target
= control target key end

     0   :  { %s349_s12 = smov 0   ;;  %s382_s0 = inlined_call_operand.vmem [shape: f32[128,128], index: 0, kind: input, shape index: {}]   ;;  %s383_s1 = inlined_call_operand.vmem [shape: f32[1,128], index: 1, kind: input, shape index: {}]   ;;  %s384_s2 = inlined_call_operand.vmem [shape: f32[1,128], index: 2, kind: input, shape index: {}]   ;;  %s385_s3 = inlined_call_operand.vmem [shape: f32[128,128], index: 3, kind: output, shape index: {}]  }
   0x1 LB: > { %s300_s13 = sadd.s32 4294967295, %s327_s12   ;;  %p304_p0 = scmp.ge.s32.totalorder %s327_s12, 1  ;;  %s327_s12 = sphi %s349_s12, %s13_s12  }
   0x2   : > { %p138_p1 = scmp.lt.s32.totalorder %s327_s12, 3 }
   0x4   : > { %p139_p2 = pnand %p304_p0, %p138_p1 }
   0x5   : > { %s305_s14 = sshll.u32 (!%p139_p2), %s300_s13, 3  ;;  %v309_v0 = vld [vmem:[%s383_s1] ss:$0 sm:$0xff] (!%p139_p2) }
   0x6   : > { %142 = sbr.rel (%p139_p2) target bundleno = 32 (0x20), region = 32  ;;  %p163_p3 = scmp.lt.s32.totalorder (!%p139_p2), %s305_s14, 15  ;;  %v310_v1 = vld [vmem:[%s384_s2] ss:$0 sm:$0xff] (!%p139_p2) }
   0xd   : > { %s387_s14 = smov (!%p163_p3, %s305_s14), 15 }
   0xe   : > { %s306_s15 = sshll.u32 %s387_s14, 3 }
   0xf   : > { %s166_s20 = scalar_lea.vmem %s382_s0, %s306_s15  ;;  %s369_s25 = scalar_lea.vmem %s385_s3, %s306_s15 }
  0x10   : > { %v174_v2 = vld [vmem:[%s166_s20] sm:$0xff]  ;;  %v175_v3 = vld [vmem:[%s166_s20 + $0x8] sm:$0xff]  ;;  %v176_v4 = vld [vmem:[%s166_s20 + $0x10] sm:$0xff] }
  0x11   : > { %v189_v5 = vmul.f32 %v309_v0, %v174_v2  ;;  %v190_v6 = vmul.f32 %v309_v0, %v175_v3  ;;  %v191_v7 = vmul.f32 %v309_v0, %v176_v4  ;;  %v177_v8 = vld [vmem:[%s166_s20 + $0x18] sm:$0xff]  ;;  %v178_v9 = vld [vmem:[%s166_s20 + $0x20] sm:$0xff]  ;;  %v179_v10 = vld [vmem:[%s166_s20 + $0x28] sm:$0xff] }
  0x12   : > { %v192_v11 = vmul.f32 %v309_v0, %v177_v8  ;;  %v193_v12 = vmul.f32 %v309_v0, %v178_v9  ;;  %v194_v13 = vmul.f32 %v309_v0, %v179_v10  ;;  %v180_v14 = vld [vmem:[%s166_s20 + $0x30] sm:$0xff]  ;;  %v181_v15 = vld [vmem:[%s166_s20 + $0x38] sm:$0xff] }
  0x13   : > { %v204_v16 = vadd.f32 %v310_v1, %v189_v5  ;;  %v205_v17 = vadd.f32 %v310_v1, %v190_v6  ;;  %v206_v18 = vadd.f32 %v310_v1, %v191_v7  ;;  %v195_v19 = vmul.f32 %v309_v0, %v180_v14 }
  0x14   : > { %v207_v20 = vadd.f32 %v310_v1, %v192_v11  ;;  %v208_v21 = vadd.f32 %v310_v1, %v193_v12  ;;  %v209_v22 = vadd.f32 %v310_v1, %v194_v13  ;;  %v196_v23 = vmul.f32 %v309_v0, %v181_v15 }
  0x15   : > { %vm212_vm0 = vcmp.gt.f32.partialorder %v204_v16, 0.0  ;;  %v220_v24 = vmul.f32 0.01, %v204_v16  ;;  %vm213_vm1 = vcmp.gt.f32.partialorder %v205_v17, 0.0  ;;  %v221_v25 = vmul.f32 0.01, %v205_v17 }
  0x16   : > { %vm214_vm2 = vcmp.gt.f32.partialorder %v206_v18, 0.0  ;;  %v222_v26 = vmul.f32 0.01, %v206_v18  ;;  %vm215_vm3 = vcmp.gt.f32.partialorder %v207_v20, 0.0  ;;  %v223_v27 = vmul.f32 0.01, %v207_v20 }
  0x17   : > { %v228_v28 = vsel %vm212_vm0, %v204_v16, %v220_v24  ;;  %v229_v29 = vsel %vm213_vm1, %v205_v17, %v221_v25  ;;  %vm216_vm4 = vcmp.gt.f32.partialorder %v208_v21, 0.0  ;;  %v224_v30 = vmul.f32 0.01, %v208_v21 }
  0x18   : > { %236 = vst [vmem:[%s369_s25] sm:$0xff] %v228_v28  ;;  %237 = vst [vmem:[%s369_s25 + $0x8] sm:$0xff] %v229_v29  ;;  %v230_v31 = vsel %vm214_vm2, %v206_v18, %v222_v26  ;;  %v231_v32 = vsel %vm215_vm3, %v207_v20, %v223_v27  ;;  %vm217_vm5 = vcmp.gt.f32.partialorder %v209_v22, 0.0  ;;  %v225_v33 = vmul.f32 0.01, %v209_v22 }
  0x19   : > { %238 = vst [vmem:[%s369_s25 + $0x10] sm:$0xff] %v230_v31  ;;  %239 = vst [vmem:[%s369_s25 + $0x18] sm:$0xff] %v231_v32  ;;  %v232_v34 = vsel %vm216_vm4, %v208_v21, %v224_v30  ;;  %v210_v35 = vadd.f32 %v310_v1, %v195_v19  ;;  %v211_v36 = vadd.f32 %v310_v1, %v196_v23 }
  0x1a   : > { %240 = vst [vmem:[%s369_s25 + $0x20] sm:$0xff] %v232_v34  ;;  %v233_v37 = vsel %vm217_vm5, %v209_v22, %v225_v33 }
  0x1b   : > { %241 = vst [vmem:[%s369_s25 + $0x28] sm:$0xff] %v233_v37  ;;  %vm218_vm6 = vcmp.gt.f32.partialorder %v210_v35, 0.0  ;;  %v226_v38 = vmul.f32 0.01, %v210_v35  ;;  %vm219_vm7 = vcmp.gt.f32.partialorder %v211_v36, 0.0 }
  0x1c   : > { %v227_v39 = vmul.f32 0.01, %v211_v36 }
  0x1d   : > { %v234_v40 = vsel %vm218_vm6, %v210_v35, %v226_v38 }
  0x1e   : > { %v235_v41 = vsel %vm219_vm7, %v211_v36, %v227_v39  ;;  %242 = vst [vmem:[%s369_s25 + $0x30] sm:$0xff] %v234_v40 }
  0x1f   : > { %243 = vst [vmem:[%s369_s25 + $0x38] sm:$0xff] %v235_v41 }
  0x20 PF: > { %s13_s12 = sadd.s32 1, %s327_s12  }
  0x21   : > { %p10_p4 = scmp.ge.s32.totalorder %s13_s12, 4  }
  0x23   :  { %12 = sbr.rel (!%p10_p4) target bundleno = 1 (0x1), region = 62 }

// kernel: convblock_apply.4
= control target key start
LH: loop header
LB: loop body
LE: loop exit
PB: predicated region body
PF: predicated region fallthrough
CT: control target
= control target key end

     0   :  { %s2322_s12 = smov 0   ;;  %s2324_s13 = smov 0   ;;  %s2701_s0 = inlined_call_operand.vmem [shape: bf16[2,288,96], index: 0, kind: input, shape index: {}]   ;;  %s2702_s1 = inlined_call_operand.vmem [shape: bf16[3,96,32], index: 1, kind: input, shape index: {}]   ;;  %s2703_s2 = inlined_call_operand.vmem [shape: f32[2,256,32], index: 2, kind: output, shape index: {0}]   ;;  %s2704_s3 = inlined_call_operand.vmem [shape: f32[2,8,32], index: 3, kind: output, shape index: {1}]  }
   0x1   :  { %s2326_s14 = smov 0  }
   0x2 LB: > { %s26_s15 = sadd.s32 1, %s2295_s13  ;;  %p1701_p0 = scmp.ge.s32.totalorder %s2299_s14, 1  ;;  %s2299_s14 = sphi %s2326_s14, %s14_s14   ;;  %s2295_s13 = sphi %s2324_s13, %s2706_s13   ;;  %s2291_s12 = sphi %s2322_s12, %s2705_s12  }
   0x3   : > { %p28_p1 = scmp.ge.s32.totalorder %s26_s15, 2  ;;  %p154_p2 = scmp.lt.s32.totalorder %s2299_s14, 3 }
   0x5   : > { %s2708_s15 = smov (%p28_p1, %s26_s15), 0  ;;  %p155_p3 = pnand %p1701_p0, %p154_p2 }
   0x6   : > { %v2211_v0 = vld [vmem:[%s2702_s1 + $0x30] sm:$0xff] (!%p155_p3)   ;;  %p186_p4 = scmp.lt.s32.totalorder (!%p155_p3), %s2291_s12, 1  ;;  %v2212_v1 = vld [vmem:[%s2702_s1] sm:$0xff] (!%p155_p3)   ;;  %v2213_v2 = vld [vmem:[%s2702_s1 + $0x38] sm:$0xff] (!%p155_p3)   ;;  %vm427_vm0 = vcmask (!%p155_p3), 785408   ;;  %vm210_vm1 = vcmask (!%p155_p3), 261120  }
   0x7   : > { %158 = sbr.rel (%p155_p3) target bundleno = 361 (0x169), region = 28  ;;  %1977 = vmatprep.subr.bf16.mxu1 (!%p155_p3), %v2211_v0  ;;  %2021 = vmatprep.subr.bf16.mxu0 (!%p155_p3), %v2212_v1  ;;  %v2214_v3 = vld [vmem:[%s2702_s1 + $0x8] sm:$0xff] (!%p155_p3)   ;;  %v2215_v4 = vld [vmem:[%s2702_s1 + $0x40] sm:$0xff] (!%p155_p3)   ;;  %v2360_v5 = vld [vmem:[%s2702_s1 + $0x10] sm:$0xff] (!%p155_p3)   ;;  %vm1473_vm2 = vcmask (!%p155_p3), 253952  }
   0x8   : > { %1978 = vmatpush3.bf16.msra.mxu1 (!%p155_p3), %v2211_v0  ;;  %2022 = vmatpush3.bf16.msra.mxu0 (!%p155_p3), %v2212_v1  ;;  %v2217_v6 = vld [vmem:[%s2702_s1 + $0x48] sm:$0xff] (!%p155_p3)   ;;  %v2370_v7 = vld [vmem:[%s2702_s1 + $0x18] sm:$0xff] (!%p155_p3)   ;;  %v2219_v8 = vld [vmem:[%s2702_s1 + $0x50] sm:$0xff] (!%p155_p3)  }
   0x9   : > { %1979 = vmatprep.subr.bf16.mxu1 (!%p155_p3), %v2213_v2  ;;  %2023 = vmatprep.subr.bf16.mxu0 (!%p155_p3), %v2214_v3  ;;  %v2383_v9 = vld [vmem:[%s2702_s1 + $0x20] sm:$0xff] (!%p155_p3)   ;;  %v2221_v12 = vld [vmem:[%s2702_s1 + $0x58] sm:$0xff] (!%p155_p3)   ;;  %v2399_v13 = vld [vmem:[%s2702_s1 + $0x28] sm:$0xff] (!%p155_p3)  }
   0xa   : > { %v2227_v15 = vld [vmem:[%s2702_s1 + $0x60] sm:$0xff] (!%p155_p3)   ;;  %v2228_v17 = vld [vmem:[%s2702_s1 + $0x68] sm:$0xff] (!%p155_p3)   ;;  %v2233_v21 = vld [vmem:[%s2702_s1 + $0x70] sm:$0xff] (!%p155_p3)  }
   0xb   : > { %v2238_v25 = vld [vmem:[%s2702_s1 + $0x78] sm:$0xff] (!%p155_p3)   ;;  %v2239_v27 = vld [vmem:[%s2702_s1 + $0x80] sm:$0xff] (!%p155_p3)   ;;  %v2244_v31 = vld [vmem:[%s2702_s1 + $0x88] sm:$0xff] (!%p155_p3)  }
   0xc   : > { %1980 = vmatpush3.bf16.msra.mxu1 (!%p155_p3), %v2213_v2  ;;  %2024 = vmatpush3.bf16.msra.mxu0 (!%p155_p3), %v2214_v3  ;;  %v2301_v2 = vmov (!%p155_p3), 0.0  }
   0xd   : > { %1981 = vmatprep.subr.bf16.mxu1 (!%p155_p3), %v2215_v4  ;;  %2025 = vmatprep.subr.bf16.mxu0 (!%p155_p3), %v2360_v5 }
   0xe   : > { %s2710_s12 = smov (!%p186_p4, %s2291_s12), 1 }
   0xf   : > { %s2185_s28 = smul.u32 144, %s2710_s12  ;;  %s1705_s6 = sshll.u32 %s2710_s12, 3 }
  0x10   : > { %1982 = vmatpush3.bf16.msra.mxu1 %v2215_v4  ;;  %2026 = vmatpush3.bf16.msra.mxu0 %v2360_v5  ;;  %s2526_s10 = scalar_lea.vmem %s2704_s3, %s1705_s6 }
  0x11   : > { %s2375_s8 = scalar_lea.vmem %s2701_s0, %s2185_s28  ;;  %1983 = vmatprep.subr.bf16.mxu1 %v2217_v6  ;;  %2027 = vmatprep.subr.bf16.mxu0 %v2370_v7  ;;  %211 = vst.msk [vmem:[%s2526_s10] sm:$0xff] %vm210_vm1, %v2301_v2 }
  0x12   : > { %v2223_v10 = vld [vmem:[%s2375_s8 + $0x8] sm:$0xff]   ;;  %v2224_v11 = vld [vmem:[%s2375_s8] sm:$0xff]   ;;  %v2225_v14 = vld [vmem:[%s2375_s8 + $0x10] sm:$0xff]  }
  0x13   : > { %1989 = vmatprep.mubr.msk.bf16.mxu1 %vm427_vm0, %v2223_v10  ;;  %2033 = vmatprep.mubr.msk.bf16.mxu0 %vm427_vm0, %v2224_v11  ;;  %v2226_v16 = vld [vmem:[%s2375_s8 + $0x8] sm:$0xff]   ;;  %v2229_v18 = vld [vmem:[%s2375_s8 + $0x18] sm:$0xff]   ;;  %v2230_v19 = vld [vmem:[%s2375_s8 + $0x10] sm:$0xff]  }
  0x14   : > { %1984 = vmatpush3.bf16.msra.mxu1 %v2217_v6  ;;  %2028 = vmatpush3.bf16.msra.mxu0 %v2370_v7  ;;  %v2231_v20 = vld [vmem:[%s2375_s8 + $0x20] sm:$0xff]   ;;  %v2232_v22 = vld [vmem:[%s2375_s8 + $0x18] sm:$0xff]   ;;  %v2234_v23 = vld [vmem:[%s2375_s8 + $0x28] sm:$0xff]  }
  0x15   : > { %1985 = vmatprep.subr.bf16.mxu1 %v2219_v8  ;;  %2029 = vmatprep.subr.bf16.mxu0 %v2383_v9  ;;  %v2235_v24 = vld [vmem:[%s2375_s8 + $0x20] sm:$0xff]   ;;  %v2236_v26 = vld [vmem:[%s2375_s8 + $0x30] sm:$0xff]   ;;  %v2237_v28 = vld [vmem:[%s2375_s8 + $0x28] sm:$0xff]  }
  0x16   : > { %v2240_v29 = vld [vmem:[%s2375_s8 + $0x38] sm:$0xff]   ;;  %v2241_v30 = vld [vmem:[%s2375_s8 + $0x30] sm:$0xff]   ;;  %v2242_v32 = vld [vmem:[%s2375_s8 + $0x40] sm:$0xff]  }
  0x17   : > { %v2243_v33 = vld [vmem:[%s2375_s8 + $0x38] sm:$0xff]   ;;  %v2245_v34 = vld [vmem:[%s2375_s8 + $0x48] sm:$0xff]   ;;  %v2246_v35 = vld [vmem:[%s2375_s8 + $0x10] sm:$0xff]  }
  0x18   : > { %1986 = vmatpush3.bf16.msra.mxu1 %v2219_v8  ;;  %2030 = vmatpush3.bf16.msra.mxu0 %v2383_v9  ;;  %v2247_v36 = vld [vmem:[%s2375_s8 + $0x50] sm:$0xff]   ;;  %v2248_v37 = vld [vmem:[%s2375_s8 + $0x18] sm:$0xff]   ;;  %v2250_v39 = vld [vmem:[%s2375_s8 + $0x20] sm:$0xff]  }
  0x19   : > { %1987 = vmatprep.subr.bf16.mxu1 %v2221_v12  ;;  %2031 = vmatprep.subr.bf16.mxu0 %v2399_v13  ;;  %v2249_v38 = vld [vmem:[%s2375_s8 + $0x58] sm:$0xff]   ;;  %v2251_v40 = vld [vmem:[%s2375_s8 + $0x60] sm:$0xff]   ;;  %v2252_v41 = vld [vmem:[%s2375_s8 + $0x28] sm:$0xff]  }
  0x1a   : > { %v2253_v42 = vld [vmem:[%s2375_s8 + $0x68] sm:$0xff]   ;;  %v2254_v43 = vld [vmem:[%s2375_s8 + $0x30] sm:$0xff]   ;;  %v2256_v45 = vld [vmem:[%s2375_s8 + $0x38] sm:$0xff]  }
  0x1b   : > { %v2255_v44 = vld [vmem:[%s2375_s8 + $0x70] sm:$0xff]   ;;  %v2257_v46 = vld [vmem:[%s2375_s8 + $0x78] sm:$0xff]   ;;  %v2258_v47 = vld [vmem:[%s2375_s8 + $0x40] sm:$0xff]  }
  0x1c   : > { %1988 = vmatpush3.bf16.msra.mxu1 %v2221_v12  ;;  %2032 = vmatpush3.bf16.msra.mxu0 %v2399_v13  ;;  %v2259_v48 = vld [vmem:[%s2375_s8 + $0x80] sm:$0xff]   ;;  %v2260_v49 = vld [vmem:[%s2375_s8 + $0x48] sm:$0xff]   ;;  %v2262_v51 = vld [vmem:[%s2375_s8 + $0x50] sm:$0xff]  }
  0x1d   : > { %2109 = vmatprep.subr.bf16.mxu1 %v2212_v1  ;;  %2065 = vmatprep.subr.bf16.mxu0 %v2227_v15  ;;  %v2261_v50 = vld [vmem:[%s2375_s8 + $0x40] sm:$0xff]   ;;  %v2263_v52 = vld [vmem:[%s2375_s8 + $0x48] sm:$0xff]   ;;  %v2264_v53 = vld [vmem:[%s2375_s8 + $0x58] sm:$0xff]  }
  0x1e   : > { %v2265_v54 = vld [vmem:[%s2375_s8 + $0x50] sm:$0xff]   ;;  %v2266_v55 = vld [vmem:[%s2375_s8 + $0x60] sm:$0xff]   ;;  %v2267_v56 = vld [vmem:[%s2375_s8 + $0x58] sm:$0xff]  }
  0x1f   : > { %1990 = vmatmul.mubr.msk.bf16.vlgmr.msra.gmra.mrb[0].mxu1 %vm427_vm0, %v2225_v14  ;;  %2034 = vmatmul.mubr.msk.bf16.vlgmr.msra.gmra.mrb[0].mxu0 %vm427_vm0, %v2226_v16  ;;  %v2268_v57 = vld [vmem:[%s2375_s8 + $0x68] sm:$0xff]   ;;  %v2269_v58 = vld [vmem:[%s2375_s8 + $0x60] sm:$0xff]   ;;  %v2270_v59 = vld [vmem:[%s2375_s8 + $0x70] sm:$0xff]  }
  0x20   : > { %2115 = vmatpush3.bf16.msra.mxu1 %v2212_v1  ;;  %2066 = vmatpush3.bf16.msra.mxu0 %v2227_v15  ;;  %v2271_v60 = vld [vmem:[%s2375_s8 + $0x68] sm:$0xff]   ;;  %v2272_v61 = vld [vmem:[%s2375_s8 + $0x78] sm:$0xff]   ;;  %v2273_v62 = vld [vmem:[%s2375_s8 + $0x70] sm:$0xff]  }
  0x21   : > { %1993 = vmatprep.mubr.msk.bf16.mxu1 %vm427_vm0, %v2229_v18  ;;  %2067 = vmatprep.subr.bf16.mxu0 %v2228_v17  ;;  %v2274_v63 = vld [vmem:[%s2375_s8 + $0x80] sm:$0xff]   ;;  %v2275_v0 = vld [vmem:[%s2375_s8 + $0x78] sm:$0xff]   ;;  %v2276_v1 = vld [vmem:[%s2375_s8 + $0x88] sm:$0xff]   ;;  %s1910_s8 = sshll.u32 %s2710_s12, 8 }
  0x22   : > { %2037 = vmatprep.mubr.msk.bf16.mxu0 %vm427_vm0, %v2230_v19  ;;  %2110 = vmatprep.subr.bf16.mxu1 %v2214_v3  ;;  %s2550_s17 = scalar_lea.vmem %s2703_s2, %s1910_s8 }
  0x24   : > { %2116 = vmatpush3.bf16.msra.mxu1 %v2214_v3  ;;  %2068 = vmatpush3.bf16.msra.mxu0 %v2228_v17 }
  0x25   : > { %2111 = vmatprep.subr.bf16.mxu1 %v2360_v5  ;;  %2069 = vmatprep.subr.bf16.mxu0 %v2233_v21 }
  0x27   : > { %1994 = vmatmul.mubr.msk.bf16.gmra.mrb[4].mxu1 %vm427_vm0, %v2231_v20  ;;  %2038 = vmatmul.mubr.msk.bf16.gmra.mrb[4].mxu0 %vm427_vm0, %v2232_v22 }
  0x28   : > { %1997 = vmatprep.mubr.msk.bf16.mxu1 %vm427_vm0, %v2234_v23  ;;  %2070 = vmatpush3.bf16.msra.mxu0 %v2233_v21 }
  0x29   : > { %2041 = vmatprep.mubr.msk.bf16.mxu0 %vm427_vm0, %v2235_v24  ;;  %2071 = vmatprep.subr.bf16.mxu0 %v2238_v25 }
  0x2a   : > { %2117 = vmatpush3.bf16.msra.mxu1 %v2360_v5 }
  0x2b   : > { %2112 = vmatprep.subr.bf16.mxu1 %v2370_v7 }
  0x2c   : > { %2072 = vmatpush3.bf16.msra.mxu0 %v2238_v25 }
  0x2d   : > { %2073 = vmatprep.subr.bf16.mxu0 %v2239_v27 }
  0x2e   : > { %2118 = vmatpush3.bf16.msra.mxu1 %v2370_v7 }
  0x2f   : > { %1998 = vmatmul.mubr.msk.bf16.gmra.mrb[8].mxu1 %vm427_vm0, %v2236_v26  ;;  %2113 = vmatprep.subr.bf16.mxu1 %v2383_v9 }
  0x30   : > { %2042 = vmatmul.mubr.msk.bf16.gmra.mrb[8].mxu0 %vm427_vm0, %v2237_v28  ;;  %2001 = vmatprep.mubr.msk.bf16.mxu1 %vm427_vm0, %v2240_v29 }
  0x31   : > { %2045 = vmatprep.mubr.msk.bf16.mxu0 %vm427_vm0, %v2241_v30  ;;  %2074 = vmatpush3.bf16.msra.mxu0 %v2239_v27 }
  0x32   : > { %2075 = vmatprep.subr.bf16.mxu0 %v2244_v31  ;;  %2119 = vmatpush3.bf16.msra.mxu1 %v2383_v9 }
  0x33   : > { %2114 = vmatprep.subr.bf16.mxu1 %v2399_v13 }
  0x35   : > { %2076 = vmatpush3.bf16.msra.mxu0 %v2244_v31 }
  0x36   : > { %2120 = vmatpush3.bf16.msra.mxu1 %v2399_v13 }
  0x37   : > { %2002 = vmatmul.mubr.msk.bf16.gmra.mrb[12].mxu1 %vm427_vm0, %v2242_v32 }
  0x38   : > { %2046 = vmatmul.mubr.msk.bf16.gmra.mrb[12].mxu0 %vm427_vm0, %v2243_v33  ;;  %2005 = vmatprep.mubr.msk.bf16.mxu1 %vm427_vm0, %v2245_v34 }
  0x39   : > { %2077 = vmatprep.mubr.msk.bf16.mxu0 %vm427_vm0, %v2246_v35 }
  0x3f   : > { %2006 = vmatmul.mubr.msk.bf16.gmra.mrb[16].mxu1 %vm427_vm0, %v2247_v36 }
  0x40   : > { %2078 = vmatmul.mubr.msk.bf16.vlgmr.msra.gmra.mrb[0].mxu0 %vm427_vm0, %v2248_v37  ;;  %2009 = vmatprep.mubr.msk.bf16.mxu1 %vm427_vm0, %v2249_v38 }
  0x41   : > { %2081 = vmatprep.mubr.msk.bf16.mxu0 %vm427_vm0, %v2250_v39 }
  0x47   : > { %2010 = vmatmul.mubr.msk.bf16.gmra.mrb[20].mxu1 %vm427_vm0, %v2251_v40 }
  0x48   : > { %2082 = vmatmul.mubr.msk.bf16.gmra.mrb[4].mxu0 %vm427_vm0, %v2252_v41  ;;  %2013 = vmatprep.mubr.msk.bf16.mxu1 %vm427_vm0, %v2253_v42 }
  0x49   : > { %2085 = vmatprep.mubr.msk.bf16.mxu0 %vm427_vm0, %v2254_v43 }
  0x4f   : > { %2014 = vmatmul.mubr.msk.bf16.gmra.mrb[24].mxu1 %vm427_vm0, %v2255_v44 }
  0x50   : > { %2086 = vmatmul.mubr.msk.bf16.gmra.mrb[8].mxu0 %vm427_vm0, %v2256_v45  ;;  %2017 = vmatprep.mubr.msk.bf16.mxu1 %vm427_vm0, %v2257_v46 }
  0x51   : > { %2089 = vmatprep.mubr.msk.bf16.mxu0 %vm427_vm0, %v2258_v47 }
  0x57   : > { %2018 = vmatmul.mubr.msk.bf16.gmra.mrb[28].mxu1 %vm427_vm0, %v2259_v48 }
  0x58   : > { %2090 = vmatmul.mubr.msk.bf16.gmra.mrb[12].mxu0 %vm427_vm0, %v2260_v49  ;;  %2049 = vmatprep.mubr.msk.bf16.mxu1 %vm427_vm0, %v2261_v50 }
  0x59   : > { %2093 = vmatprep.mubr.msk.bf16.mxu0 %vm427_vm0, %v2262_v51 }
  0x5f   : > { %2050 = vmatmul.mubr.msk.bf16.vlgmr.msra.gmra.mrb[16].mxu1 %vm427_vm0, %v2263_v52 }
  0x60   : > { %2094 = vmatmul.mubr.msk.bf16.gmra.mrb[16].mxu0 %vm427_vm0, %v2264_v53  ;;  %2053 = vmatprep.mubr.msk.bf16.mxu1 %vm427_vm0, %v2265_v54 }
  0x61   : > { %2097 = vmatprep.mubr.msk.bf16.mxu0 %vm427_vm0, %v2266_v55 }
  0x67   : > { %2054 = vmatmul.mubr.msk.bf16.gmra.mrb[20].mxu1 %vm427_vm0, %v2267_v56 }
  0x68   : > { %2098 = vmatmul.mubr.msk.bf16.gmra.mrb[20].mxu0 %vm427_vm0, %v2268_v57  ;;  %2057 = vmatprep.mubr.msk.bf16.mxu1 %vm427_vm0, %v2269_v58 }
  0x69   : > { %2101 = vmatprep.mubr.msk.bf16.mxu0 %vm427_vm0, %v2270_v59 }
  0x6f   : > { %2058 = vmatmul.mubr.msk.bf16.gmra.mrb[24].mxu1 %vm427_vm0, %v2271_v60 }
  0x70   : > { %2102 = vmatmul.mubr.msk.bf16.gmra.mrb[24].mxu0 %vm427_vm0, %v2272_v61  ;;  %2061 = vmatprep.mubr.msk.bf16.mxu1 %vm427_vm0, %v2273_v62 }
  0x71   : > { %2105 = vmatprep.mubr.msk.bf16.mxu0 %vm427_vm0, %v2274_v63 }
  0x77   : > { %2062 = vmatmul.mubr.msk.bf16.gmra.mrb[28].mxu1 %vm427_vm0, %v2275_v0 }
  0x78   : > { %2106 = vmatmul.mubr.msk.bf16.gmra.mrb[28].mxu0 %vm427_vm0, %v2276_v1 }
  0xf2   : > { %v1991_v3 = vpop.f32.mrb[0].mxu1 }
  0xf3   : > { %v510_v4 = vpop.f32.mrb[1].mxu1 }
  0xf4   : > { %v1992_v5 = vpop.f32.mrb[2].mxu1 }
  0xf5   : > { %v513_v6 = vpop.f32.mrb[3].mxu1 }
  0xfa   : > { %v1995_v7 = vpop.f32.mrb[4].mxu1 }
  0xfb   : > { %v526_v8 = vpop.f32.mrb[5].mxu1 }
  0xfc   : > { %v1996_v9 = vpop.f32.mrb[6].mxu1 }
  0xfd   : > { %v529_v10 = vpop.f32.mrb[7].mxu1 }
 0x102   : > { %v2530_v11 = vpop.f32.mrb[8].mxu1 }
 0x103   : > { %v2532_v12 = vpop.f32.mrb[9].mxu1 }
 0x104   : > { %v2534_v13 = vpop.f32.mrb[10].mxu1 }
 0x105   : > { %v2536_v14 = vpop.f32.mrb[11].mxu1 }
 0x10a   : > { %v2538_v15 = vpop.f32.mrb[12].mxu1 }
 0x10b   : > { %v2540_v16 = vpop.f32.mrb[13].mxu1 }
 0x10c   : > { %v2542_v17 = vpop.f32.mrb[14].mxu1 }
 0x10d   : > { %v2544_v18 = vpop.f32.mrb[15].mxu1 }
 0x113   : > { %v2079_v19 = vpop.f32.mrb[0].mxu0 }
 0x114   : > { %v2121_v20 = vadd.f32 %v2079_v19, %v1991_v3  ;;  %v1210_v21 = vpop.f32.mrb[1].mxu0 }
 0x115   : > { %v2122_v22 = vadd.f32 %v1210_v21, %v510_v4  ;;  %v2080_v23 = vpop.f32.mrb[2].mxu0 }
 0x116   : > { %1372 = vst.msk [vmem:[%s2550_s17 + $0x10] sm:$0xff] %vm210_vm1, %v2121_v20  ;;  %v2123_v24 = vadd.f32 %v2080_v23, %v1992_v5  ;;  %v1213_v25 = vpop.f32.mrb[3].mxu0  ;;  %v1478_v28 = vmul.f32 %v2121_v20, %v2121_v20  ;;  %v1406_v34 = vsel %vm210_vm1, %v2121_v20, 0.0 }
 0x117   : > { %1370 = vst.msk [vmem:[%s2550_s17] sm:$0xff] %vm210_vm1, %v2122_v22  ;;  %v1476_v26 = vmul.f32 %v2122_v22, %v2122_v22  ;;  %v2124_v27 = vadd.f32 %v1213_v25, %v513_v6  ;;  %v1403_v29 = vsel %vm210_vm1, %v2122_v22, 0.0 }
 0x118   : > { %1373 = vst.msk [vmem:[%s2550_s17 + $0x18] sm:$0xff] %vm210_vm1, %v2123_v24  ;;  %v1479_v32 = vmul.f32 %v2123_v24, %v2123_v24  ;;  %v1511_v42 = vsel %vm210_vm1, %v1478_v28, 0.0  ;;  %v1408_v43 = vsel %vm210_vm1, %v2123_v24, 0.0 }
 0x119   : > { %1371 = vst.msk [vmem:[%s2550_s17 + $0x8] sm:$0xff] %vm210_vm1, %v2124_v27  ;;  %v1404_v30 = vsel %vm210_vm1, %v2124_v27, 0.0  ;;  %v1477_v31 = vmul.f32 %v2124_v27, %v2124_v27  ;;  %v1508_v35 = vsel %vm210_vm1, %v1476_v26, 0.0 }
 0x11a   : > { %v1405_v33 = vadd.f32 %v1404_v30, %v1403_v29  ;;  %v1513_v46 = vsel %vm210_vm1, %v1479_v32, 0.0 }
 0x11b   : > { %v1509_v36 = vsel %vm210_vm1, %v1477_v31, 0.0  ;;  %v2083_v37 = vpop.f32.mrb[4].mxu0 }
 0x11c   : > { %v1407_v38 = vadd.f32 %v1406_v34, %v1405_v33  ;;  %v1510_v39 = vadd.f32 %v1509_v36, %v1508_v35  ;;  %v2125_v40 = vadd.f32 %v2083_v37, %v1995_v7  ;;  %v1226_v41 = vpop.f32.mrb[5].mxu0 }
 0x11d   : > { %v2126_v44 = vadd.f32 %v1226_v41, %v526_v8  ;;  %v2084_v45 = vpop.f32.mrb[6].mxu0 }
 0x11e   : > { %v1512_v47 = vadd.f32 %v1511_v42, %v1510_v39  ;;  %1376 = vst.msk [vmem:[%s2550_s17 + $0x30] sm:$0xff] %vm210_vm1, %v2125_v40  ;;  %v1409_v48 = vadd.f32 %v1408_v43, %v1407_v38  ;;  %v1229_v49 = vpop.f32.mrb[7].mxu0  ;;  %v2127_v52 = vadd.f32 %v2084_v45, %v1996_v9  ;;  %v1482_v58 = vmul.f32 %v2125_v40, %v2125_v40 }
 0x11f   : > { %1374 = vst.msk [vmem:[%s2550_s17 + $0x20] sm:$0xff] %vm210_vm1, %v2126_v44  ;;  %v1410_v50 = vsel %vm210_vm1, %v2126_v44, 0.0  ;;  %v1480_v51 = vmul.f32 %v2126_v44, %v2126_v44  ;;  %v2128_v53 = vadd.f32 %v1229_v49, %v529_v10  ;;  %v1414_v62 = vsel %vm210_vm1, %v2125_v40, 0.0 }
 0x120   : > { %v1411_v54 = vadd.f32 %v1410_v50, %v1409_v48  ;;  %v1514_v55 = vadd.f32 %v1513_v46, %v1512_v47  ;;  %1377 = vst.msk [vmem:[%s2550_s17 + $0x38] sm:$0xff] %vm210_vm1, %v2127_v52  ;;  %v1483_v0 = vmul.f32 %v2127_v52, %v2127_v52  ;;  %v1416_v5 = vsel %vm210_vm1, %v2127_v52, 0.0 }
 0x121   : > { %v1515_v56 = vsel %vm210_vm1, %v1480_v51, 0.0  ;;  %1375 = vst.msk [vmem:[%s2550_s17 + $0x28] sm:$0xff] %vm210_vm1, %v2128_v53  ;;  %v1412_v57 = vsel %vm210_vm1, %v2128_v53, 0.0  ;;  %v1481_v61 = vmul.f32 %v2128_v53, %v2128_v53  ;;  %v1519_v9 = vsel %vm210_vm1, %v1482_v58, 0.0 }
 0x122   : > { %v1516_v59 = vadd.f32 %v1515_v56, %v1514_v55  ;;  %v1413_v60 = vadd.f32 %v1412_v57, %v1411_v54 }
 0x123   : > { %v2087_v63 = vpop.f32.mrb[8].mxu0  ;;  %v1517_v2 = vsel %vm210_vm1, %v1481_v61, 0.0 }
 0x124   : > { %v1415_v1 = vadd.f32 %v1414_v62, %v1413_v60  ;;  %v2129_v3 = vadd.f32 %v2087_v63, %v2530_v11  ;;  %v1242_v4 = vpop.f32.mrb[9].mxu0  ;;  %v1518_v6 = vadd.f32 %v1517_v2, %v1516_v59 }
 0x125   : > { %v2130_v7 = vadd.f32 %v1242_v4, %v2532_v12  ;;  %v2088_v8 = vpop.f32.mrb[10].mxu0  ;;  %v1521_v12 = vsel %vm210_vm1, %v1483_v0, 0.0 }
 0x126   : > { %1380 = vst.msk [vmem:[%s2550_s17 + $0x50] sm:$0xff] %vm210_vm1, %v2129_v3  ;;  %v1417_v10 = vadd.f32 %v1416_v5, %v1415_v1  ;;  %v2131_v19 = vadd.f32 %v2088_v8, %v2534_v13  ;;  %v1245_v20 = vpop.f32.mrb[11].mxu0  ;;  %v1520_v21 = vadd.f32 %v1519_v9, %v1518_v6  ;;  %v1486_v28 = vmul.f32 %v2129_v3, %v2129_v3 }
 0x127   : > { %1378 = vst.msk [vmem:[%s2550_s17 + $0x40] sm:$0xff] %vm210_vm1, %v2130_v7  ;;  %v1418_v11 = vsel %vm210_vm1, %v2130_v7, 0.0  ;;  %v1484_v22 = vmul.f32 %v2130_v7, %v2130_v7  ;;  %v2132_v23 = vadd.f32 %v1245_v20, %v2536_v14  ;;  %v1422_v30 = vsel %vm210_vm1, %v2129_v3, 0.0 }
 0x128   : > { %v1419_v24 = vadd.f32 %v1418_v11, %v1417_v10  ;;  %1381 = vst.msk [vmem:[%s2550_s17 + $0x58] sm:$0xff] %vm210_vm1, %v2131_v19  ;;  %v1522_v25 = vadd.f32 %v1521_v12, %v1520_v21  ;;  %v1487_v33 = vmul.f32 %v2131_v19, %v2131_v19  ;;  %v1424_v37 = vsel %vm210_vm1, %v2131_v19, 0.0 }
 0x129   : > { %v1523_v26 = vsel %vm210_vm1, %v1484_v22, 0.0  ;;  %1379 = vst.msk [vmem:[%s2550_s17 + $0x48] sm:$0xff] %vm210_vm1, %v2132_v23  ;;  %v1420_v13 = vsel %vm210_vm1, %v2132_v23, 0.0  ;;  %v1485_v27 = vmul.f32 %v2132_v23, %v2132_v23  ;;  %v1527_v41 = vsel %vm210_vm1, %v1486_v28, 0.0 }
 0x12a   : > { %v1421_v29 = vadd.f32 %v1420_v13, %v1419_v24  ;;  %v1524_v31 = vadd.f32 %v1523_v26, %v1522_v25 }
 0x12b   : > { %v1525_v14 = vsel %vm210_vm1, %v1485_v27, 0.0  ;;  %v2091_v32 = vpop.f32.mrb[12].mxu0 }
 0x12c   : > { %v1423_v34 = vadd.f32 %v1422_v30, %v1421_v29  ;;  %v2133_v35 = vadd.f32 %v2091_v32, %v2538_v15  ;;  %v1258_v36 = vpop.f32.mrb[13].mxu0  ;;  %v1526_v38 = vadd.f32 %v1525_v14, %v1524_v31 }
 0x12d   : > { %v2134_v39 = vadd.f32 %v1258_v36, %v2540_v16  ;;  %v2092_v40 = vpop.f32.mrb[14].mxu0  ;;  %v1529_v16 = vsel %vm210_vm1, %v1487_v33, 0.0 }
 0x12e   : > { %1384 = vst.msk [vmem:[%s2550_s17 + $0x70] sm:$0xff] %vm210_vm1, %v2133_v35  ;;  %v1425_v42 = vadd.f32 %v1424_v37, %v1423_v34  ;;  %v2135_v43 = vadd.f32 %v2092_v40, %v2542_v17  ;;  %v1261_v44 = vpop.f32.mrb[15].mxu0  ;;  %v1528_v45 = vadd.f32 %v1527_v41, %v1526_v38  ;;  %v1490_v52 = vmul.f32 %v2133_v35, %v2133_v35 }
 0x12f   : > { %1382 = vst.msk [vmem:[%s2550_s17 + $0x60] sm:$0xff] %vm210_vm1, %v2134_v39  ;;  %v1426_v15 = vsel %vm210_vm1, %v2134_v39, 0.0  ;;  %v1488_v46 = vmul.f32 %v2134_v39, %v2134_v39  ;;  %v2136_v47 = vadd.f32 %v1261_v44, %v2544_v18  ;;  %v1430_v55 = vsel %vm210_vm1, %v2133_v35, 0.0 }
 0x130   : > { %v1427_v48 = vadd.f32 %v1426_v15, %v1425_v42  ;;  %1385 = vst.msk [vmem:[%s2550_s17 + $0x78] sm:$0xff] %vm210_vm1, %v2135_v43  ;;  %v1530_v49 = vadd.f32 %v1529_v16, %v1528_v45  ;;  %v1491_v59 = vmul.f32 %v2135_v43, %v2135_v43  ;;  %v1432_v0 = vsel %vm210_vm1, %v2135_v43, 0.0 }
 0x131   : > { %v1531_v50 = vsel %vm210_vm1, %v1488_v46, 0.0  ;;  %1383 = vst.msk [vmem:[%s2550_s17 + $0x68] sm:$0xff] %vm210_vm1, %v2136_v47  ;;  %v1428_v17 = vsel %vm210_vm1, %v2136_v47, 0.0  ;;  %v1489_v51 = vmul.f32 %v2136_v47, %v2136_v47  ;;  %v1535_v5 = vsel %vm210_vm1, %v1490_v52, 0.0 }
 0x132   : > { %v1429_v53 = vadd.f32 %v1428_v17, %v1427_v48  ;;  %v2051_v54 = vpop.f32.mrb[16].mxu1  ;;  %v1532_v18 = vadd.f32 %v1531_v50, %v1530_v49  ;;  %v1537_v21 = vsel %vm210_vm1, %v1491_v59, 0.0 }
 0x133   : > { %v1533_v56 = vsel %vm210_vm1, %v1489_v51, 0.0  ;;  %v2095_v57 = vpop.f32.mrb[16].mxu0  ;;  %v899_v58 = vpop.f32.mrb[17].mxu1 }
 0x134   : > { %v1431_v60 = vadd.f32 %v1430_v55, %v1429_v53  ;;  %v2137_v61 = vadd.f32 %v2095_v57, %v2051_v54  ;;  %v1274_v62 = vpop.f32.mrb[17].mxu0  ;;  %v2052_v63 = vpop.f32.mrb[18].mxu1  ;;  %v1534_v1 = vadd.f32 %v1533_v56, %v1532_v18 }
 0x135   : > { %v2138_v2 = vadd.f32 %v1274_v62, %v899_v58  ;;  %v2096_v3 = vpop.f32.mrb[18].mxu0  ;;  %v902_v4 = vpop.f32.mrb[19].mxu1 }
 0x136   : > { %1388 = vst.msk [vmem:[%s2550_s17 + $0x90] sm:$0xff] %vm210_vm1, %v2137_v61  ;;  %v1433_v6 = vadd.f32 %v1432_v0, %v1431_v60  ;;  %v2139_v7 = vadd.f32 %v2096_v3, %v2052_v63  ;;  %v1277_v8 = vpop.f32.mrb[19].mxu0  ;;  %v1536_v9 = vadd.f32 %v1535_v5, %v1534_v1  ;;  %v1494_v25 = vmul.f32 %v2137_v61, %v2137_v61 }
 0x137   : > { %1386 = vst.msk [vmem:[%s2550_s17 + $0x80] sm:$0xff] %vm210_vm1, %v2138_v2  ;;  %v1434_v10 = vsel %vm210_vm1, %v2138_v2, 0.0  ;;  %v1492_v19 = vmul.f32 %v2138_v2, %v2138_v2  ;;  %v2140_v20 = vadd.f32 %v1277_v8, %v902_v4  ;;  %v1438_v27 = vsel %vm210_vm1, %v2137_v61, 0.0 }
 0x138   : > { %v1435_v11 = vadd.f32 %v1434_v10, %v1433_v6  ;;  %1389 = vst.msk [vmem:[%s2550_s17 + $0x98] sm:$0xff] %vm210_vm1, %v2139_v7  ;;  %v1538_v22 = vadd.f32 %v1537_v21, %v1536_v9  ;;  %v1495_v14 = vmul.f32 %v2139_v7, %v2139_v7  ;;  %v1440_v36 = vsel %vm210_vm1, %v2139_v7, 0.0 }
 0x139   : > { %v1539_v23 = vsel %vm210_vm1, %v1492_v19, 0.0  ;;  %1387 = vst.msk [vmem:[%s2550_s17 + $0x88] sm:$0xff] %vm210_vm1, %v2140_v20  ;;  %v1436_v12 = vsel %vm210_vm1, %v2140_v20, 0.0  ;;  %v1493_v24 = vmul.f32 %v2140_v20, %v2140_v20  ;;  %v1543_v41 = vsel %vm210_vm1, %v1494_v25, 0.0 }
 0x13a   : > { %v1437_v26 = vadd.f32 %v1436_v12, %v1435_v11  ;;  %v2055_v13 = vpop.f32.mrb[20].mxu1  ;;  %v1540_v28 = vadd.f32 %v1539_v23, %v1538_v22  ;;  %v1545_v16 = vsel %vm210_vm1, %v1495_v14, 0.0 }
 0x13b   : > { %v1541_v29 = vsel %vm210_vm1, %v1493_v24, 0.0  ;;  %v2099_v30 = vpop.f32.mrb[20].mxu0  ;;  %v915_v31 = vpop.f32.mrb[21].mxu1 }
 0x13c   : > { %v1439_v32 = vadd.f32 %v1438_v27, %v1437_v26  ;;  %v2141_v33 = vadd.f32 %v2099_v30, %v2055_v13  ;;  %v1290_v34 = vpop.f32.mrb[21].mxu0  ;;  %v2056_v35 = vpop.f32.mrb[22].mxu1  ;;  %v1542_v37 = vadd.f32 %v1541_v29, %v1540_v28 }
 0x13d   : > { %v2142_v38 = vadd.f32 %v1290_v34, %v915_v31  ;;  %v2100_v39 = vpop.f32.mrb[22].mxu0  ;;  %v918_v40 = vpop.f32.mrb[23].mxu1 }
 0x13e   : > { %1392 = vst.msk [vmem:[%s2550_s17 + $0xb0] sm:$0xff] %vm210_vm1, %v2141_v33  ;;  %v1441_v42 = vadd.f32 %v1440_v36, %v1439_v32  ;;  %v2143_v43 = vadd.f32 %v2100_v39, %v2056_v35  ;;  %v1293_v44 = vpop.f32.mrb[23].mxu0  ;;  %v1544_v45 = vadd.f32 %v1543_v41, %v1542_v37  ;;  %v1498_v52 = vmul.f32 %v2141_v33, %v2141_v33 }
 0x13f   : > { %1390 = vst.msk [vmem:[%s2550_s17 + $0xa0] sm:$0xff] %vm210_vm1, %v2142_v38  ;;  %v1442_v15 = vsel %vm210_vm1, %v2142_v38, 0.0  ;;  %v1496_v46 = vmul.f32 %v2142_v38, %v2142_v38  ;;  %v2144_v47 = vadd.f32 %v1293_v44, %v918_v40  ;;  %v1446_v55 = vsel %vm210_vm1, %v2141_v33, 0.0 }
 0x140   : > { %v1443_v48 = vadd.f32 %v1442_v15, %v1441_v42  ;;  %1393 = vst.msk [vmem:[%s2550_s17 + $0xb8] sm:$0xff] %vm210_vm1, %v2143_v43  ;;  %v1546_v49 = vadd.f32 %v1545_v16, %v1544_v45  ;;  %v1499_v59 = vmul.f32 %v2143_v43, %v2143_v43  ;;  %v1448_v0 = vsel %vm210_vm1, %v2143_v43, 0.0 }
 0x141   : > { %v1547_v50 = vsel %vm210_vm1, %v1496_v46, 0.0  ;;  %1391 = vst.msk [vmem:[%s2550_s17 + $0xa8] sm:$0xff] %vm210_vm1, %v2144_v47  ;;  %v1444_v17 = vsel %vm210_vm1, %v2144_v47, 0.0  ;;  %v1497_v51 = vmul.f32 %v2144_v47, %v2144_v47  ;;  %v1551_v5 = vsel %vm210_vm1, %v1498_v52, 0.0 }
 0x142   : > { %v1445_v53 = vadd.f32 %v1444_v17, %v1443_v48  ;;  %v2059_v54 = vpop.f32.mrb[24].mxu1  ;;  %v1548_v18 = vadd.f32 %v1547_v50, %v1546_v49  ;;  %v1553_v21 = vsel %vm210_vm1, %v1499_v59, 0.0 }
 0x143   : > { %v1549_v56 = vsel %vm210_vm1, %v1497_v51, 0.0  ;;  %v2103_v57 = vpop.f32.mrb[24].mxu0  ;;  %v931_v58 = vpop.f32.mrb[25].mxu1 }
 0x144   : > { %v1447_v60 = vadd.f32 %v1446_v55, %v1445_v53  ;;  %v2145_v61 = vadd.f32 %v2103_v57, %v2059_v54  ;;  %v1306_v62 = vpop.f32.mrb[25].mxu0  ;;  %v2060_v63 = vpop.f32.mrb[26].mxu1  ;;  %v1550_v1 = vadd.f32 %v1549_v56, %v1548_v18 }
 0x145   : > { %v2146_v2 = vadd.f32 %v1306_v62, %v931_v58  ;;  %v2104_v3 = vpop.f32.mrb[26].mxu0  ;;  %v934_v4 = vpop.f32.mrb[27].mxu1 }
 0x146   : > { %1396 = vst.msk [vmem:[%s2550_s17 + $0xd0] sm:$0xff] %vm210_vm1, %v2145_v61  ;;  %v1449_v6 = vadd.f32 %v1448_v0, %v1447_v60  ;;  %v2147_v7 = vadd.f32 %v2104_v3, %v2060_v63  ;;  %v1309_v8 = vpop.f32.mrb[27].mxu0  ;;  %v1552_v9 = vadd.f32 %v1551_v5, %v1550_v1  ;;  %v1502_v25 = vmul.f32 %v2145_v61, %v2145_v61 }
 0x147   : > { %1394 = vst.msk [vmem:[%s2550_s17 + $0xc0] sm:$0xff] %vm210_vm1, %v2146_v2  ;;  %v1450_v10 = vsel %vm210_vm1, %v2146_v2, 0.0  ;;  %v1500_v19 = vmul.f32 %v2146_v2, %v2146_v2  ;;  %v2148_v20 = vadd.f32 %v1309_v8, %v934_v4  ;;  %v1454_v27 = vsel %vm210_vm1, %v2145_v61, 0.0 }
 0x148   : > { %v1451_v11 = vadd.f32 %v1450_v10, %v1449_v6  ;;  %1397 = vst.msk [vmem:[%s2550_s17 + $0xd8] sm:$0xff] %vm210_vm1, %v2147_v7  ;;  %v1554_v22 = vadd.f32 %v1553_v21, %v1552_v9  ;;  %v1503_v14 = vmul.f32 %v2147_v7, %v2147_v7  ;;  %v1456_v36 = vsel %vm210_vm1, %v2147_v7, 0.0  ;;  %v1402_v9 = vld [vmem:[%s2526_s10] sm:$0x1] }
 0x149   : > { %v1555_v23 = vsel %vm210_vm1, %v1500_v19, 0.0  ;;  %1395 = vst.msk [vmem:[%s2550_s17 + $0xc8] sm:$0xff] %vm210_vm1, %v2148_v20  ;;  %v1452_v12 = vsel %vm210_vm1, %v2148_v20, 0.0  ;;  %v1501_v24 = vmul.f32 %v2148_v20, %v2148_v20  ;;  %v1559_v41 = vsel %vm210_vm1, %v1502_v25, 0.0 }
 0x14a   : > { %v1453_v26 = vadd.f32 %v1452_v12, %v1451_v11  ;;  %v2063_v13 = vpop.f32.mrb[28].mxu1  ;;  %v1556_v28 = vadd.f32 %v1555_v23, %v1554_v22  ;;  %v1561_v16 = vsel %vm210_vm1, %v1503_v14, 0.0  ;;  %v1475_v11 = vld [vmem:[%s2526_s10 + $0x1] sm:$0x1] }
 0x14b   : > { %v1557_v29 = vsel %vm210_vm1, %v1501_v24, 0.0  ;;  %v2107_v30 = vpop.f32.mrb[28].mxu0  ;;  %v947_v31 = vpop.f32.mrb[29].mxu1 }
 0x14c   : > { %v1455_v32 = vadd.f32 %v1454_v27, %v1453_v26  ;;  %v2149_v33 = vadd.f32 %v2107_v30, %v2063_v13  ;;  %v1322_v34 = vpop.f32.mrb[29].mxu0  ;;  %v2064_v35 = vpop.f32.mrb[30].mxu1  ;;  %v1558_v37 = vadd.f32 %v1557_v29, %v1556_v28 }
 0x14d   : > { %v2150_v38 = vadd.f32 %v1322_v34, %v947_v31  ;;  %v2108_v39 = vpop.f32.mrb[30].mxu0  ;;  %v950_v40 = vpop.f32.mrb[31].mxu1 }
 0x14e   : > { %1400 = vst.msk [vmem:[%s2550_s17 + $0xf0] sm:$0xff] %vm210_vm1, %v2149_v33  ;;  %v1457_v42 = vadd.f32 %v1456_v36, %v1455_v32  ;;  %v2151_v43 = vadd.f32 %v2108_v39, %v2064_v35  ;;  %v1325_v44 = vpop.f32.mrb[31].mxu0  ;;  %v1560_v45 = vadd.f32 %v1559_v41, %v1558_v37  ;;  %v1506_v52 = vmul.f32 %v2149_v33, %v2149_v33 }
 0x14f   : > { %1398 = vst.msk [vmem:[%s2550_s17 + $0xe0] sm:$0xff] %vm210_vm1, %v2150_v38  ;;  %v1458_v15 = vsel %vm210_vm1, %v2150_v38, 0.0  ;;  %v1504_v46 = vmul.f32 %v2150_v38, %v2150_v38  ;;  %v2152_v47 = vadd.f32 %v1325_v44, %v950_v40  ;;  %v1462_v54 = vsel %vm210_vm1, %v2149_v33, 0.0 }
 0x150   : > { %v1459_v48 = vadd.f32 %v1458_v15, %v1457_v42  ;;  %1401 = vst.msk [vmem:[%s2550_s17 + $0xf8] sm:$0xff] %vm210_vm1, %v2151_v43  ;;  %v1562_v49 = vadd.f32 %v1561_v16, %v1560_v45  ;;  %v1507_v56 = vmul.f32 %v2151_v43, %v2151_v43  ;;  %v1464_v58 = vsel %vm210_vm1, %v2151_v43, 0.0 }
 0x151   : > { %v1563_v50 = vsel %vm210_vm1, %v1504_v46, 0.0  ;;  %1399 = vst.msk [vmem:[%s2550_s17 + $0xe8] sm:$0xff] %vm210_vm1, %v2152_v47  ;;  %v1460_v17 = vsel %vm210_vm1, %v2152_v47, 0.0  ;;  %v1505_v51 = vmul.f32 %v2152_v47, %v2152_v47  ;;  %v1567_v60 = vsel %vm210_vm1, %v1506_v52, 0.0 }
 0x152   : > { %v1461_v53 = vadd.f32 %v1460_v17, %v1459_v48  ;;  %v1564_v55 = vadd.f32 %v1563_v50, %v1562_v49  ;;  %v1569_v63 = vsel %vm210_vm1, %v1507_v56, 0.0 }
 0x153   : > { %v1565_v18 = vsel %vm210_vm1, %v1505_v51, 0.0 }
 0x154   : > { %v1463_v57 = vadd.f32 %v1462_v54, %v1461_v53  ;;  %v1566_v59 = vadd.f32 %v1565_v18, %v1564_v55 }
 0x156   : > { %v1465_v61 = vadd.f32 %v1464_v58, %v1463_v57  ;;  %v1568_v62 = vadd.f32 %v1567_v60, %v1566_v59 }
 0x158   : > { %v1466_v0 = vrot.slane %v1465_v61, 4  ;;  %v1570_v1 = vadd.f32 %v1569_v63, %v1568_v62 }
 0x15a   : > { %v1467_v2 = vadd.f32 %v1466_v0, %v1465_v61  ;;  %v1571_v3 = vrot.slane %v1570_v1, 4 }
 0x15c   : > { %v1468_v4 = vrot.slane %v1467_v2, 2  ;;  %v1572_v5 = vadd.f32 %v1571_v3, %v1570_v1 }
 0x15e   : > { %v1469_v6 = vadd.f32 %v1468_v4, %v1467_v2  ;;  %v1573_v7 = vrot.slane %v1572_v5, 2 }
 0x160   : > { %v1470_v8 = vrot.slane %v1469_v6, 1  ;;  %v1574_v10 = vadd.f32 %v1573_v7, %v1572_v5 }
 0x162   : > { %v1471_v19 = vadd.f32 %v1470_v8, %v1469_v6  ;;  %v1575_v20 = vrot.slane %v1574_v10, 1 }
 0x164   : > { %v1472_v21 = vadd.f32 %v1471_v19, %v1402_v9  ;;  %v1576_v22 = vadd.f32 %v1575_v20, %v1574_v10 }
 0x166   : > { %1474 = vst.msk [vmem:[%s2526_s10] sm:$0x1] %vm1473_vm2, %v1472_v21  ;;  %v1577_v23 = vadd.f32 %v1576_v22, %v1475_v11 }
 0x168   : > { %1578 = vst.msk [vmem:[%s2526_s10 + $0x1] sm:$0x1] %vm1473_vm2, %v1577_v23 }
 0x169 PF: > { %s14_s14 = sadd.s32 1, %s2299_s14   ;;  %s2705_s12 = smov %s2295_s13 }
 0x16a   : > { %p11_p5 = scmp.ge.s32.totalorder %s14_s14, 4   ;;  %s2706_s13 = smov %s2708_s15 }
 0x16c   :  { %13 = sbr.rel (!%p11_p5) target bundleno = 2 (0x2), region = 79 }

</bundles_post_ra>
